<compile_context>
chip_gen: v6e
topology: v6e:2x2x1
jax: 0.10.0
libtpu: 0.0.40
codegen_flags: <defaults>
</compile_context>

<pallas_src>
import functools
import math

import jax
import jax.numpy as jnp
from jax.experimental import pallas as pl
from jax.experimental.pallas import tpu as pltpu


def _round_up(x, m):
    return (x + m - 1) // m * m


# ----------------------------------------------------------------------------
# Fused Pallas kernel: all LSTM layers + FC
# ----------------------------------------------------------------------------
def _make_fused_kernel(num_layers, T, B_tile, H_lanes, GH):
    """GH = per-gate lane stride in the packed weight layout.

    GH <  H_lanes : packed-gate layout (gates contiguous, extracted via roll)
    GH == H_lanes : per-gate 128-lane blocks (aligned slices)
    """
    G4 = 4 * GH
    packed_gates = GH < H_lanes
    unroll = True if T <= 32 else 8        # partial unroll for long sequences

    def extract_gates(gates):
        # Returns (i, f, g, o), each (B_tile, H_lanes); valid units in lanes
        # [0, H). Higher lanes may hold bounded junk (killed by zero weight
        # rows downstream).
        if packed_gates:
            sg = jax.nn.sigmoid(gates)     # one EUP pass over all 4 gates
            th = jnp.tanh(gates)           # one EUP pass over all 4 gates

            def take(src, k):
                r = src if k == 0 else pltpu.roll(src, shift=(4 - k) * GH, axis=1)
                return r[:, :H_lanes] if G4 > H_lanes else r

            return take(sg, 0), take(sg, 1), take(th, 2), take(sg, 3)
        i_g = jax.nn.sigmoid(gates[:, 0 * GH:1 * GH])
        f_g = jax.nn.sigmoid(gates[:, 1 * GH:2 * GH])
        g_g = jnp.tanh(gates[:, 2 * GH:3 * GH])
        o_g = jax.nn.sigmoid(gates[:, 3 * GH:4 * GH])
        return i_g, f_g, g_g, o_g

    def kernel(*args):
        x_ref = args[0]
        layer_refs = args[1:1 + 3 * num_layers]
        wfc_ref = args[1 + 3 * num_layers]
        bfc_ref = args[2 + 3 * num_layers]
        out_ref = args[3 + 3 * num_layers]
        seq_sc, gx_sc = args[4 + 3 * num_layers:]

        h_last = None
        for layer in range(num_layers):
            wih_ref = layer_refs[3 * layer + 0]
            whh_ref = layer_refs[3 * layer + 1]
            b_ref = layer_refs[3 * layer + 2]
            is_last = layer == num_layers - 1

            # ---- hoisted input projection: all timesteps, one MXU GEMM
            if layer == 0:
                xin = x_ref[...]                        # (T, B_tile, Din_pad) bf16
                xin = xin.reshape(T * B_tile, xin.shape[-1])
            else:
                xin = seq_sc[...]                       # (T*B_tile, H_lanes) bf16
            gx_sc[...] = (
                jnp.dot(xin, wih_ref[...], preferred_element_type=jnp.float32)
                + b_ref[...])                           # bias added once, not per step

            whh = whh_ref[...]                          # recurrent weights, loaded once
            h0 = jnp.zeros((B_tile, H_lanes), jnp.float32)
            c0 = jnp.zeros((B_tile, H_lanes), jnp.float32)

            # ---- serial recurrence: h/c live in vregs (fori_loop carry)
            def step(t, carry):
                h, c = carry
                row = pl.multiple_of(t * B_tile, B_tile)
                gates = gx_sc[pl.ds(row, B_tile), :] + jnp.dot(
                    h.astype(jnp.bfloat16), whh,
                    preferred_element_type=jnp.float32)
                i_g, f_g, g_g, o_g = extract_gates(gates)
                c_new = f_g * c + i_g * g_g
                h_new = o_g * jnp.tanh(c_new)
                if not is_last:
                    # last layer only needs h[T-1]
                    seq_sc[pl.ds(row, B_tile), :] = h_new.astype(jnp.bfloat16)
                return h_new, c_new

            h_last, _ = jax.lax.fori_loop(0, T, step, (h0, c0), unroll=unroll)

        # ---- FC on the final hidden state (lane-dense padded output).
        # Zero rows >= H in wfc discard any junk in padded hidden lanes.
        out_ref[...] = (
            jnp.dot(h_last.astype(jnp.bfloat16), wfc_ref[...],
                    preferred_element_type=jnp.float32)
            + bfc_ref[...])

    return kernel


# ----------------------------------------------------------------------------
# Weight packing (done ONCE, outside the jitted forward)
# ----------------------------------------------------------------------------
def _pack_gate_weight(w, d_in, d_in_pad, H, GH):
    """PyTorch (4H, d_in) -> (d_in_pad, 4*GH) bf16, gate order i,f,g,o."""
    w_t = jnp.transpose(w).astype(jnp.float32)            # (d_in, 4H)
    out = jnp.zeros((d_in_pad, 4 * GH), jnp.float32)
    for g in range(4):
        out = out.at[:d_in, g * GH:g * GH + H].set(w_t[:, g * H:(g + 1) * H])
    return out.astype(jnp.bfloat16)


def _pack_gate_bias(b, H, GH):
    out = jnp.zeros((1, 4 * GH), jnp.float32)
    for g in range(4):
        out = out.at[0, g * GH:g * GH + H].set(b[g * H:(g + 1) * H])
    return out


def pack_params(params, num_layers):
    """Pack/pad/transpose/cast all weights once. Returns a flat tuple."""
    H = params["lstm_l0"][1].shape[1]                      # w_hh: (4H, H)
    H_lanes = _round_up(H, 128)
    # Packed-gate layout whenever 4*H is a multiple of 128 and H < 128.
    if H % 128 == 0 or (4 * H) % 128 != 0:
        GH = H_lanes
    else:
        GH = H
    packed = []
    for layer in range(num_layers):
        w_ih, w_hh, b_ih, b_hh = params[f"lstm_l{layer}"]
        d_in = w_ih.shape[1]
        d_in_pad = _round_up(d_in, 128) if layer == 0 else H_lanes
        packed.append(_pack_gate_weight(w_ih, d_in, d_in_pad, H, GH))
        packed.append(_pack_gate_weight(w_hh, H, H_lanes, H, GH))
        packed.append(_pack_gate_bias(b_ih + b_hh, H, GH))
    w_fc, b_fc = params["fc"]
    OUT = w_fc.shape[0]
    OUT_pad = _round_up(OUT, 128)
    wfc = jnp.zeros((H_lanes, OUT_pad), jnp.float32)
    wfc = wfc.at[:H, :OUT].set(jnp.transpose(w_fc).astype(jnp.float32))
    packed.append(wfc.astype(jnp.bfloat16))
    packed.append(jnp.zeros((1, OUT_pad), jnp.float32).at[0, :OUT].set(
        b_fc.astype(jnp.float32)))
    return tuple(packed)


# ----------------------------------------------------------------------------
# Forward wrapper
# ----------------------------------------------------------------------------
@functools.partial(jax.jit, static_argnames=("num_layers", "out_features"))
def stacked_lstm_forward(x, packed, num_layers, out_features):
    """x: (B, T, input_size) batch_first. Returns (B, out_features)."""
    B, T, Din = x.shape
    H_lanes = packed[1].shape[0]                           # whh: (H_lanes, 4*GH)
    GH = packed[1].shape[1] // 4
    Din_pad = packed[0].shape[0]
    OUT_pad = packed[3 * num_layers].shape[1]

    # Batch padded to a multiple of 16 (bf16-tile aligned scratch stores);
    # tiled into <=128-row blocks for the batch-parallel grid.
    B_pad = _round_up(B, 16)
    if B_pad > 128:
        B_pad = _round_up(B_pad, 128)
    B_tile = min(B_pad, 128)
    num_b_blocks = B_pad // B_tile

    # time-major, zero-padded, bf16 (kernel GEMM operands are bf16 anyway)
    x_tm = jnp.transpose(x, (1, 0, 2)).astype(jnp.float32)
    x_tm = jnp.pad(x_tm, ((0, 0), (0, B_pad - B), (0, Din_pad - Din)))
    x_tm = x_tm.astype(jnp.bfloat16)

    kernel = _make_fused_kernel(num_layers, T, B_tile, H_lanes, GH)

    def _full(shape):
        return pl.BlockSpec(shape, lambda b: (0, 0))

    in_specs = [pl.BlockSpec((T, B_tile, Din_pad), lambda b: (0, b, 0))]
    for layer in range(num_layers):
        in_specs.append(_full(packed[3 * layer + 0].shape))   # w_ih
        in_specs.append(_full(packed[3 * layer + 1].shape))   # w_hh
        in_specs.append(_full(packed[3 * layer + 2].shape))   # bias
    in_specs.append(_full(packed[3 * num_layers].shape))      # w_fc
    in_specs.append(_full(packed[3 * num_layers + 1].shape))  # b_fc
    out_spec = pl.BlockSpec((B_tile, OUT_pad), lambda b: (b, 0))

    scratch_shapes = [
        pltpu.VMEM((T * B_tile, H_lanes), jnp.bfloat16),   # inter-layer sequence
        pltpu.VMEM((T * B_tile, 4 * GH), jnp.float32),     # hoisted input gates
    ]

    # Explicit scoped-VMEM limit sized to residents + scratch, capped for v7x.
    needed = 2 * math.prod((T, B_tile, Din_pad)) * 2       # x block, dbl-buffered
    needed += 2 * B_tile * OUT_pad * 4                     # out block
    for p in packed:
        needed += 2 * p.size * p.dtype.itemsize            # resident weights
    needed += T * B_tile * H_lanes * 2                     # seq scratch (bf16)
    needed += T * B_tile * 4 * GH * 4                      # gx scratch (f32)
    vmem_limit = int(min(64 * 1024 * 1024, max(32 * 1024 * 1024, 2 * needed)))

    out_padded = pl.pallas_call(
        kernel,
        grid=(num_b_blocks,),
        out_shape=jax.ShapeDtypeStruct((B_pad, OUT_pad), jnp.float32),
        in_specs=in_specs,
        out_specs=out_spec,
        scratch_shapes=scratch_shapes,
        compiler_params=pltpu.CompilerParams(
            dimension_semantics=("parallel",),
            vmem_limit_bytes=vmem_limit),
    )(x_tm, *packed)
    # dropout(p=0.2): eval-mode identity.
    return out_padded[:B, :out_features]


# ----------------------------------------------------------------------------
# Pure-JAX reference (f32) for correctness check
# ----------------------------------------------------------------------------
def reference_forward(x, params, num_layers, hidden_size):
    B, T, _ = x.shape
    H = hidden_size
    h_seq = x.astype(jnp.float32)
    for layer in range(num_layers):
        w_ih, w_hh, b_ih, b_hh = params[f"lstm_l{layer}"]
        h = jnp.zeros((B, H), jnp.float32)
        c = jnp.zeros((B, H), jnp.float32)
        outs = []
        for t in range(T):
            gates = h_seq[:, t, :] @ w_ih.T + h @ w_hh.T + b_ih + b_hh
            i = jax.nn.sigmoid(gates[:, 0 * H:1 * H])
            f = jax.nn.sigmoid(gates[:, 1 * H:2 * H])
            g = jnp.tanh(gates[:, 2 * H:3 * H])
            o = jax.nn.sigmoid(gates[:, 3 * H:4 * H])
            c = f * c + i * g
            h = o * jnp.tanh(c)
            outs.append(h)
        h_seq = jnp.stack(outs, axis=1)
    w_fc, b_fc = params["fc"]
    return h_seq[:, -1, :] @ w_fc.T + b_fc


# ----------------------------------------------------------------------------
# Deterministic PyTorch-style init: uniform(-1/sqrt(H), 1/sqrt(H))
# ----------------------------------------------------------------------------
def init_params(key, input_size, hidden_size, num_layers):
    params = {}
    bound = 1.0 / jnp.sqrt(jnp.float32(hidden_size))
    for layer in range(num_layers):
        d_in = input_size if layer == 0 else hidden_size
        key, k1, k2, k3, k4 = jax.random.split(key, 5)
        w_ih = jax.random.uniform(k1, (4 * hidden_size, d_in), jnp.float32, -bound, bound)
        w_hh = jax.random.uniform(k2, (4 * hidden_size, hidden_size), jnp.float32, -bound, bound)
        b_ih = jax.random.uniform(k3, (4 * hidden_size,), jnp.float32, -bound, bound)
        b_hh = jax.random.uniform(k4, (4 * hidden_size,), jnp.float32, -bound, bound)
        params[f"lstm_l{layer}"] = (w_ih, w_hh, b_ih, b_hh)
    key, k1, k2 = jax.random.split(key, 3)
    w_fc = jax.random.uniform(k1, (100, hidden_size), jnp.float32, -bound, bound)
    b_fc = jax.random.uniform(k2, (100,), jnp.float32, -bound, bound)
    params["fc"] = (w_fc, b_fc)
    return params


# ----------------------------------------------------------------------------
if __name__ == "__main__":
    batch, seq, input_size, hidden_size, num_layers = 2, 8, 16, 32, 2

    key = jax.random.PRNGKey(0)
    key, xk, pk = jax.random.split(key, 3)
    x = jax.random.normal(xk, (batch, seq, input_size), jnp.float32)
    params = init_params(pk, input_size, hidden_size, num_layers)

    packed = pack_params(params, num_layers)       # packed once, outside jit
    out = stacked_lstm_forward(x, packed, num_layers=num_layers, out_features=100)
    out = jax.block_until_ready(out)

    ref = reference_forward(x, params, num_layers, hidden_size)
    assert out.shape == (batch, 100), out.shape
    # bf16 MXU operands with f32 accumulation -> looser tolerance vs f32 ref.
    assert jnp.allclose(out, ref, atol=5e-2, rtol=5e-2), "mismatch vs reference"

    print("KERNEL_OK")
</pallas_src>

<mosaic_0001>
module attributes {stable_mosaic.version = 11 : i64} {
  func.func @kernel(%arg0: i32, %arg1: memref<8x16x128xbf16, #tpu.memory_space<vmem>>, %arg2: memref<128x128xbf16, #tpu.memory_space<vmem>>, %arg3: memref<128x128xbf16, #tpu.memory_space<vmem>>, %arg4: memref<1x128xf32, #tpu.memory_space<vmem>>, %arg5: memref<128x128xbf16, #tpu.memory_space<vmem>>, %arg6: memref<128x128xbf16, #tpu.memory_space<vmem>>, %arg7: memref<1x128xf32, #tpu.memory_space<vmem>>, %arg8: memref<128x128xbf16, #tpu.memory_space<vmem>>, %arg9: memref<1x128xf32, #tpu.memory_space<vmem>>, %arg10: memref<16x128xf32, #tpu.memory_space<vmem>>, %arg11: memref<128x128xbf16, #tpu.memory_space<vmem>>, %arg12: memref<128x128xf32, #tpu.memory_space<vmem>>) attributes {dimension_semantics = [#tpu.dimension_semantics<parallel>], iteration_bounds = array<i64: 1>, scalar_prefetch = 0 : i64, scratch_operands = 2 : i64, tpu.core_type = #tpu.core_type<tc>, window_params = [{transform_indices = @transform_0, window_bounds = array<i64: 8, 16, 128>}, {pipeline_mode = #tpu.pipeline_mode<synchronous>, transform_indices = @transform_1, window_bounds = array<i64: 128, 128>}, {pipeline_mode = #tpu.pipeline_mode<synchronous>, transform_indices = @transform_2, window_bounds = array<i64: 128, 128>}, {pipeline_mode = #tpu.pipeline_mode<synchronous>, transform_indices = @transform_3, window_bounds = array<i64: 1, 128>}, {pipeline_mode = #tpu.pipeline_mode<synchronous>, transform_indices = @transform_4, window_bounds = array<i64: 128, 128>}, {pipeline_mode = #tpu.pipeline_mode<synchronous>, transform_indices = @transform_5, window_bounds = array<i64: 128, 128>}, {pipeline_mode = #tpu.pipeline_mode<synchronous>, transform_indices = @transform_6, window_bounds = array<i64: 1, 128>}, {pipeline_mode = #tpu.pipeline_mode<synchronous>, transform_indices = @transform_7, window_bounds = array<i64: 128, 128>}, {pipeline_mode = #tpu.pipeline_mode<synchronous>, transform_indices = @transform_8, window_bounds = array<i64: 1, 128>}, {transform_indices = @transform_9, window_bounds = array<i64: 16, 128>}]} {
    %c0 = arith.constant 0 : index
    %c0_0 = arith.constant 0 : index
    %c0_1 = arith.constant 0 : index
    %0 = vector.load %arg1[%c0, %c0_0, %c0_1] : memref<8x16x128xbf16, #tpu.memory_space<vmem>>, vector<8x16x128xbf16>
    %1 = vector.shape_cast %0 : vector<8x16x128xbf16> to vector<128x128xbf16>
    %c0_2 = arith.constant 0 : index
    %c0_3 = arith.constant 0 : index
    %2 = vector.load %arg2[%c0_2, %c0_3] : memref<128x128xbf16, #tpu.memory_space<vmem>>, vector<128x128xbf16>
    %cst = arith.constant dense<0.000000e+00> : vector<128x128xf32>
    %3 = tpu.matmul %1, %2, %cst {dimension_numbers = #tpu.dot_dimension_numbers<[1], [0], [0], [1], [0, 0, 1, 1], [], []>} : vector<128x128xbf16>, vector<128x128xbf16>, vector<128x128xf32> -> vector<128x128xf32>
    %c0_4 = arith.constant 0 : index
    %c0_5 = arith.constant 0 : index
    %4 = vector.load %arg4[%c0_4, %c0_5] : memref<1x128xf32, #tpu.memory_space<vmem>>, vector<1x128xf32>
    %5 = vector.broadcast %4 : vector<1x128xf32> to vector<128x128xf32>
    %6 = arith.addf %3, %5 : vector<128x128xf32>
    %c0_6 = arith.constant 0 : index
    %c0_7 = arith.constant 0 : index
    %7 = vector.load %arg12[%c0_6, %c0_7] : memref<128x128xf32, #tpu.memory_space<vmem>>, vector<128x128xf32>
    tpu.vector_store %arg12[%c0_6, %c0_7], %6 {strides = array<i32>} : memref<128x128xf32, #tpu.memory_space<vmem>>, vector<128x128xf32>,
    %c0_8 = arith.constant 0 : index
    %c0_9 = arith.constant 0 : index
    %8 = vector.load %arg3[%c0_8, %c0_9] : memref<128x128xbf16, #tpu.memory_space<vmem>>, vector<128x128xbf16>
    %cst_10 = arith.constant 0.000000e+00 : f32
    %9 = vector.broadcast %cst_10 : f32 to vector<16x128xf32>
    %cst_11 = arith.constant 0.000000e+00 : f32
    %10 = vector.broadcast %cst_11 : f32 to vector<16x128xf32>
    %c0_i32 = arith.constant 0 : i32
    %c16_i32 = arith.constant 16 : i32
    %11 = arith.muli %c0_i32, %c16_i32 : i32
    %12 = tpu.assume_multiple %11, 16 : i32
    %13 = arith.index_cast %12 : i32 to index
    %c0_12 = arith.constant 0 : index
    %14 = vector.load %arg12[%13, %c0_12] : memref<128x128xf32, #tpu.memory_space<vmem>>, vector<16x128xf32>
    %15 = arith.truncf %9 : vector<16x128xf32> to vector<16x128xbf16>
    %cst_13 = arith.constant dense<0.000000e+00> : vector<16x128xf32>
    %16 = tpu.matmul %15, %8, %cst_13 {dimension_numbers = #tpu.dot_dimension_numbers<[1], [0], [0], [1], [0, 0, 1, 1], [], []>} : vector<16x128xbf16>, vector<128x128xbf16>, vector<16x128xf32> -> vector<16x128xf32>
    %17 = arith.addf %14, %16 : vector<16x128xf32>
    %18 = arith.negf %17 : vector<16x128xf32>
    %19 = math.exp %18 : vector<16x128xf32>
    %cst_14 = arith.constant 1.000000e+00 : f32
    %20 = vector.broadcast %cst_14 : f32 to vector<16x128xf32>
    %21 = arith.addf %20, %19 : vector<16x128xf32>
    %22 = arith.divf %20, %21 : vector<16x128xf32>
    %23 = math.tanh %17 : vector<16x128xf32>
    %c96_i32 = arith.constant 96 : i32
    %24 = tpu.dynamic_rotate %22 by %c96_i32 dim 1 : vector<16x128xf32>, i32 -> vector<16x128xf32>
    %c64_i32 = arith.constant 64 : i32
    %25 = tpu.dynamic_rotate %23 by %c64_i32 dim 1 : vector<16x128xf32>, i32 -> vector<16x128xf32>
    %c32_i32 = arith.constant 32 : i32
    %26 = tpu.dynamic_rotate %22 by %c32_i32 dim 1 : vector<16x128xf32>, i32 -> vector<16x128xf32>
    %27 = arith.mulf %24, %10 : vector<16x128xf32>
    %28 = arith.mulf %22, %25 : vector<16x128xf32>
    %29 = arith.addf %27, %28 : vector<16x128xf32>
    %30 = math.tanh %29 : vector<16x128xf32>
    %31 = arith.mulf %26, %30 : vector<16x128xf32>
    %32 = arith.truncf %31 : vector<16x128xf32> to vector<16x128xbf16>
    %33 = arith.index_cast %12 : i32 to index
    %c0_15 = arith.constant 0 : index
    %34 = vector.load %arg11[%33, %c0_15] : memref<128x128xbf16, #tpu.memory_space<vmem>>, vector<16x128xbf16>
    tpu.vector_store %arg11[%33, %c0_15], %32 {strides = array<i32>} : memref<128x128xbf16, #tpu.memory_space<vmem>>, vector<16x128xbf16>,
    %c1_i32 = arith.constant 1 : i32
    %c16_i32_16 = arith.constant 16 : i32
    %35 = arith.muli %c1_i32, %c16_i32_16 : i32
    %36 = tpu.assume_multiple %35, 16 : i32
    %37 = arith.index_cast %36 : i32 to index
    %c0_17 = arith.constant 0 : index
    %38 = vector.load %arg12[%37, %c0_17] : memref<128x128xf32, #tpu.memory_space<vmem>>, vector<16x128xf32>
    %39 = arith.truncf %31 : vector<16x128xf32> to vector<16x128xbf16>
    %cst_18 = arith.constant dense<0.000000e+00> : vector<16x128xf32>
    %40 = tpu.matmul %39, %8, %cst_18 {dimension_numbers = #tpu.dot_dimension_numbers<[1], [0], [0], [1], [0, 0, 1, 1], [], []>} : vector<16x128xbf16>, vector<128x128xbf16>, vector<16x128xf32> -> vector<16x128xf32>
    %41 = arith.addf %38, %40 : vector<16x128xf32>
    %42 = arith.negf %41 : vector<16x128xf32>
    %43 = math.exp %42 : vector<16x128xf32>
    %cst_19 = arith.constant 1.000000e+00 : f32
    %44 = vector.broadcast %cst_19 : f32 to vector<16x128xf32>
    %45 = arith.addf %44, %43 : vector<16x128xf32>
    %46 = arith.divf %44, %45 : vector<16x128xf32>
    %47 = math.tanh %41 : vector<16x128xf32>
    %c96_i32_20 = arith.constant 96 : i32
    %48 = tpu.dynamic_rotate %46 by %c96_i32_20 dim 1 : vector<16x128xf32>, i32 -> vector<16x128xf32>
    %c64_i32_21 = arith.constant 64 : i32
    %49 = tpu.dynamic_rotate %47 by %c64_i32_21 dim 1 : vector<16x128xf32>, i32 -> vector<16x128xf32>
    %c32_i32_22 = arith.constant 32 : i32
    %50 = tpu.dynamic_rotate %46 by %c32_i32_22 dim 1 : vector<16x128xf32>, i32 -> vector<16x128xf32>
    %51 = arith.mulf %48, %29 : vector<16x128xf32>
    %52 = arith.mulf %46, %49 : vector<16x128xf32>
    %53 = arith.addf %51, %52 : vector<16x128xf32>
    %54 = math.tanh %53 : vector<16x128xf32>
    %55 = arith.mulf %50, %54 : vector<16x128xf32>
    %56 = arith.truncf %55 : vector<16x128xf32> to vector<16x128xbf16>
    %57 = arith.index_cast %36 : i32 to index
    %c0_23 = arith.constant 0 : index
    %58 = vector.load %arg11[%57, %c0_23] : memref<128x128xbf16, #tpu.memory_space<vmem>>, vector<16x128xbf16>
    tpu.vector_store %arg11[%57, %c0_23], %56 {strides = array<i32>} : memref<128x128xbf16, #tpu.memory_space<vmem>>, vector<16x128xbf16>,
    %c2_i32 = arith.constant 2 : i32
    %c16_i32_24 = arith.constant 16 : i32
    %59 = arith.muli %c2_i32, %c16_i32_24 : i32
    %60 = tpu.assume_multiple %59, 16 : i32
    %61 = arith.index_cast %60 : i32 to index
    %c0_25 = arith.constant 0 : index
    %62 = vector.load %arg12[%61, %c0_25] : memref<128x128xf32, #tpu.memory_space<vmem>>, vector<16x128xf32>
    %63 = arith.truncf %55 : vector<16x128xf32> to vector<16x128xbf16>
    %cst_26 = arith.constant dense<0.000000e+00> : vector<16x128xf32>
    %64 = tpu.matmul %63, %8, %cst_26 {dimension_numbers = #tpu.dot_dimension_numbers<[1], [0], [0], [1], [0, 0, 1, 1], [], []>} : vector<16x128xbf16>, vector<128x128xbf16>, vector<16x128xf32> -> vector<16x128xf32>
    %65 = arith.addf %62, %64 : vector<16x128xf32>
    %66 = arith.negf %65 : vector<16x128xf32>
    %67 = math.exp %66 : vector<16x128xf32>
    %cst_27 = arith.constant 1.000000e+00 : f32
    %68 = vector.broadcast %cst_27 : f32 to vector<16x128xf32>
    %69 = arith.addf %68, %67 : vector<16x128xf32>
    %70 = arith.divf %68, %69 : vector<16x128xf32>
    %71 = math.tanh %65 : vector<16x128xf32>
    %c96_i32_28 = arith.constant 96 : i32
    %72 = tpu.dynamic_rotate %70 by %c96_i32_28 dim 1 : vector<16x128xf32>, i32 -> vector<16x128xf32>
    %c64_i32_29 = arith.constant 64 : i32
    %73 = tpu.dynamic_rotate %71 by %c64_i32_29 dim 1 : vector<16x128xf32>, i32 -> vector<16x128xf32>
    %c32_i32_30 = arith.constant 32 : i32
    %74 = tpu.dynamic_rotate %70 by %c32_i32_30 dim 1 : vector<16x128xf32>, i32 -> vector<16x128xf32>
    %75 = arith.mulf %72, %53 : vector<16x128xf32>
    %76 = arith.mulf %70, %73 : vector<16x128xf32>
    %77 = arith.addf %75, %76 : vector<16x128xf32>
    %78 = math.tanh %77 : vector<16x128xf32>
    %79 = arith.mulf %74, %78 : vector<16x128xf32>
    %80 = arith.truncf %79 : vector<16x128xf32> to vector<16x128xbf16>
    %81 = arith.index_cast %60 : i32 to index
    %c0_31 = arith.constant 0 : index
    %82 = vector.load %arg11[%81, %c0_31] : memref<128x128xbf16, #tpu.memory_space<vmem>>, vector<16x128xbf16>
    tpu.vector_store %arg11[%81, %c0_31], %80 {strides = array<i32>} : memref<128x128xbf16, #tpu.memory_space<vmem>>, vector<16x128xbf16>,
    %c3_i32 = arith.constant 3 : i32
    %c16_i32_32 = arith.constant 16 : i32
    %83 = arith.muli %c3_i32, %c16_i32_32 : i32
    %84 = tpu.assume_multiple %83, 16 : i32
    %85 = arith.index_cast %84 : i32 to index
    %c0_33 = arith.constant 0 : index
    %86 = vector.load %arg12[%85, %c0_33] : memref<128x128xf32, #tpu.memory_space<vmem>>, vector<16x128xf32>
    %87 = arith.truncf %79 : vector<16x128xf32> to vector<16x128xbf16>
    %cst_34 = arith.constant dense<0.000000e+00> : vector<16x128xf32>
    %88 = tpu.matmul %87, %8, %cst_34 {dimension_numbers = #tpu.dot_dimension_numbers<[1], [0], [0], [1], [0, 0, 1, 1], [], []>} : vector<16x128xbf16>, vector<128x128xbf16>, vector<16x128xf32> -> vector<16x128xf32>
    %89 = arith.addf %86, %88 : vector<16x128xf32>
    %90 = arith.negf %89 : vector<16x128xf32>
    %91 = math.exp %90 : vector<16x128xf32>
    %cst_35 = arith.constant 1.000000e+00 : f32
    %92 = vector.broadcast %cst_35 : f32 to vector<16x128xf32>
    %93 = arith.addf %92, %91 : vector<16x128xf32>
    %94 = arith.divf %92, %93 : vector<16x128xf32>
    %95 = math.tanh %89 : vector<16x128xf32>
    %c96_i32_36 = arith.constant 96 : i32
    %96 = tpu.dynamic_rotate %94 by %c96_i32_36 dim 1 : vector<16x128xf32>, i32 -> vector<16x128xf32>
    %c64_i32_37 = arith.constant 64 : i32
    %97 = tpu.dynamic_rotate %95 by %c64_i32_37 dim 1 : vector<16x128xf32>, i32 -> vector<16x128xf32>
    %c32_i32_38 = arith.constant 32 : i32
    %98 = tpu.dynamic_rotate %94 by %c32_i32_38 dim 1 : vector<16x128xf32>, i32 -> vector<16x128xf32>
    %99 = arith.mulf %96, %77 : vector<16x128xf32>
    %100 = arith.mulf %94, %97 : vector<16x128xf32>
    %101 = arith.addf %99, %100 : vector<16x128xf32>
    %102 = math.tanh %101 : vector<16x128xf32>
    %103 = arith.mulf %98, %102 : vector<16x128xf32>
    %104 = arith.truncf %103 : vector<16x128xf32> to vector<16x128xbf16>
    %105 = arith.index_cast %84 : i32 to index
    %c0_39 = arith.constant 0 : index
    %106 = vector.load %arg11[%105, %c0_39] : memref<128x128xbf16, #tpu.memory_space<vmem>>, vector<16x128xbf16>
    tpu.vector_store %arg11[%105, %c0_39], %104 {strides = array<i32>} : memref<128x128xbf16, #tpu.memory_space<vmem>>, vector<16x128xbf16>,
    %c4_i32 = arith.constant 4 : i32
    %c16_i32_40 = arith.constant 16 : i32
    %107 = arith.muli %c4_i32, %c16_i32_40 : i32
    %108 = tpu.assume_multiple %107, 16 : i32
    %109 = arith.index_cast %108 : i32 to index
    %c0_41 = arith.constant 0 : index
    %110 = vector.load %arg12[%109, %c0_41] : memref<128x128xf32, #tpu.memory_space<vmem>>, vector<16x128xf32>
    %111 = arith.truncf %103 : vector<16x128xf32> to vector<16x128xbf16>
    %cst_42 = arith.constant dense<0.000000e+00> : vector<16x128xf32>
    %112 = tpu.matmul %111, %8, %cst_42 {dimension_numbers = #tpu.dot_dimension_numbers<[1], [0], [0], [1], [0, 0, 1, 1], [], []>} : vector<16x128xbf16>, vector<128x128xbf16>, vector<16x128xf32> -> vector<16x128xf32>
    %113 = arith.addf %110, %112 : vector<16x128xf32>
    %114 = arith.negf %113 : vector<16x128xf32>
    %115 = math.exp %114 : vector<16x128xf32>
    %cst_43 = arith.constant 1.000000e+00 : f32
    %116 = vector.broadcast %cst_43 : f32 to vector<16x128xf32>
    %117 = arith.addf %116, %115 : vector<16x128xf32>
    %118 = arith.divf %116, %117 : vector<16x128xf32>
    %119 = math.tanh %113 : vector<16x128xf32>
    %c96_i32_44 = arith.constant 96 : i32
    %120 = tpu.dynamic_rotate %118 by %c96_i32_44 dim 1 : vector<16x128xf32>, i32 -> vector<16x128xf32>
    %c64_i32_45 = arith.constant 64 : i32
    %121 = tpu.dynamic_rotate %119 by %c64_i32_45 dim 1 : vector<16x128xf32>, i32 -> vector<16x128xf32>
    %c32_i32_46 = arith.constant 32 : i32
    %122 = tpu.dynamic_rotate %118 by %c32_i32_46 dim 1 : vector<16x128xf32>, i32 -> vector<16x128xf32>
    %123 = arith.mulf %120, %101 : vector<16x128xf32>
    %124 = arith.mulf %118, %121 : vector<16x128xf32>
    %125 = arith.addf %123, %124 : vector<16x128xf32>
    %126 = math.tanh %125 : vector<16x128xf32>
    %127 = arith.mulf %122, %126 : vector<16x128xf32>
    %128 = arith.truncf %127 : vector<16x128xf32> to vector<16x128xbf16>
    %129 = arith.index_cast %108 : i32 to index
    %c0_47 = arith.constant 0 : index
    %130 = vector.load %arg11[%129, %c0_47] : memref<128x128xbf16, #tpu.memory_space<vmem>>, vector<16x128xbf16>
    tpu.vector_store %arg11[%129, %c0_47], %128 {strides = array<i32>} : memref<128x128xbf16, #tpu.memory_space<vmem>>, vector<16x128xbf16>,
    %c5_i32 = arith.constant 5 : i32
    %c16_i32_48 = arith.constant 16 : i32
    %131 = arith.muli %c5_i32, %c16_i32_48 : i32
    %132 = tpu.assume_multiple %131, 16 : i32
    %133 = arith.index_cast %132 : i32 to index
    %c0_49 = arith.constant 0 : index
    %134 = vector.load %arg12[%133, %c0_49] : memref<128x128xf32, #tpu.memory_space<vmem>>, vector<16x128xf32>
    %135 = arith.truncf %127 : vector<16x128xf32> to vector<16x128xbf16>
    %cst_50 = arith.constant dense<0.000000e+00> : vector<16x128xf32>
    %136 = tpu.matmul %135, %8, %cst_50 {dimension_numbers = #tpu.dot_dimension_numbers<[1], [0], [0], [1], [0, 0, 1, 1], [], []>} : vector<16x128xbf16>, vector<128x128xbf16>, vector<16x128xf32> -> vector<16x128xf32>
    %137 = arith.addf %134, %136 : vector<16x128xf32>
    %138 = arith.negf %137 : vector<16x128xf32>
    %139 = math.exp %138 : vector<16x128xf32>
    %cst_51 = arith.constant 1.000000e+00 : f32
    %140 = vector.broadcast %cst_51 : f32 to vector<16x128xf32>
    %141 = arith.addf %140, %139 : vector<16x128xf32>
    %142 = arith.divf %140, %141 : vector<16x128xf32>
    %143 = math.tanh %137 : vector<16x128xf32>
    %c96_i32_52 = arith.constant 96 : i32
    %144 = tpu.dynamic_rotate %142 by %c96_i32_52 dim 1 : vector<16x128xf32>, i32 -> vector<16x128xf32>
    %c64_i32_53 = arith.constant 64 : i32
    %145 = tpu.dynamic_rotate %143 by %c64_i32_53 dim 1 : vector<16x128xf32>, i32 -> vector<16x128xf32>
    %c32_i32_54 = arith.constant 32 : i32
    %146 = tpu.dynamic_rotate %142 by %c32_i32_54 dim 1 : vector<16x128xf32>, i32 -> vector<16x128xf32>
    %147 = arith.mulf %144, %125 : vector<16x128xf32>
    %148 = arith.mulf %142, %145 : vector<16x128xf32>
    %149 = arith.addf %147, %148 : vector<16x128xf32>
    %150 = math.tanh %149 : vector<16x128xf32>
    %151 = arith.mulf %146, %150 : vector<16x128xf32>
    %152 = arith.truncf %151 : vector<16x128xf32> to vector<16x128xbf16>
    %153 = arith.index_cast %132 : i32 to index
    %c0_55 = arith.constant 0 : index
    %154 = vector.load %arg11[%153, %c0_55] : memref<128x128xbf16, #tpu.memory_space<vmem>>, vector<16x128xbf16>
    tpu.vector_store %arg11[%153, %c0_55], %152 {strides = array<i32>} : memref<128x128xbf16, #tpu.memory_space<vmem>>, vector<16x128xbf16>,
    %c6_i32 = arith.constant 6 : i32
    %c16_i32_56 = arith.constant 16 : i32
    %155 = arith.muli %c6_i32, %c16_i32_56 : i32
    %156 = tpu.assume_multiple %155, 16 : i32
    %157 = arith.index_cast %156 : i32 to index
    %c0_57 = arith.constant 0 : index
    %158 = vector.load %arg12[%157, %c0_57] : memref<128x128xf32, #tpu.memory_space<vmem>>, vector<16x128xf32>
    %159 = arith.truncf %151 : vector<16x128xf32> to vector<16x128xbf16>
    %cst_58 = arith.constant dense<0.000000e+00> : vector<16x128xf32>
    %160 = tpu.matmul %159, %8, %cst_58 {dimension_numbers = #tpu.dot_dimension_numbers<[1], [0], [0], [1], [0, 0, 1, 1], [], []>} : vector<16x128xbf16>, vector<128x128xbf16>, vector<16x128xf32> -> vector<16x128xf32>
    %161 = arith.addf %158, %160 : vector<16x128xf32>
    %162 = arith.negf %161 : vector<16x128xf32>
    %163 = math.exp %162 : vector<16x128xf32>
    %cst_59 = arith.constant 1.000000e+00 : f32
    %164 = vector.broadcast %cst_59 : f32 to vector<16x128xf32>
    %165 = arith.addf %164, %163 : vector<16x128xf32>
    %166 = arith.divf %164, %165 : vector<16x128xf32>
    %167 = math.tanh %161 : vector<16x128xf32>
    %c96_i32_60 = arith.constant 96 : i32
    %168 = tpu.dynamic_rotate %166 by %c96_i32_60 dim 1 : vector<16x128xf32>, i32 -> vector<16x128xf32>
    %c64_i32_61 = arith.constant 64 : i32
    %169 = tpu.dynamic_rotate %167 by %c64_i32_61 dim 1 : vector<16x128xf32>, i32 -> vector<16x128xf32>
    %c32_i32_62 = arith.constant 32 : i32
    %170 = tpu.dynamic_rotate %166 by %c32_i32_62 dim 1 : vector<16x128xf32>, i32 -> vector<16x128xf32>
    %171 = arith.mulf %168, %149 : vector<16x128xf32>
    %172 = arith.mulf %166, %169 : vector<16x128xf32>
    %173 = arith.addf %171, %172 : vector<16x128xf32>
    %174 = math.tanh %173 : vector<16x128xf32>
    %175 = arith.mulf %170, %174 : vector<16x128xf32>
    %176 = arith.truncf %175 : vector<16x128xf32> to vector<16x128xbf16>
    %177 = arith.index_cast %156 : i32 to index
    %c0_63 = arith.constant 0 : index
    %178 = vector.load %arg11[%177, %c0_63] : memref<128x128xbf16, #tpu.memory_space<vmem>>, vector<16x128xbf16>
    tpu.vector_store %arg11[%177, %c0_63], %176 {strides = array<i32>} : memref<128x128xbf16, #tpu.memory_space<vmem>>, vector<16x128xbf16>,
    %c7_i32 = arith.constant 7 : i32
    %c16_i32_64 = arith.constant 16 : i32
    %179 = arith.muli %c7_i32, %c16_i32_64 : i32
    %180 = tpu.assume_multiple %179, 16 : i32
    %181 = arith.index_cast %180 : i32 to index
    %c0_65 = arith.constant 0 : index
    %182 = vector.load %arg12[%181, %c0_65] : memref<128x128xf32, #tpu.memory_space<vmem>>, vector<16x128xf32>
    %183 = arith.truncf %175 : vector<16x128xf32> to vector<16x128xbf16>
    %cst_66 = arith.constant dense<0.000000e+00> : vector<16x128xf32>
    %184 = tpu.matmul %183, %8, %cst_66 {dimension_numbers = #tpu.dot_dimension_numbers<[1], [0], [0], [1], [0, 0, 1, 1], [], []>} : vector<16x128xbf16>, vector<128x128xbf16>, vector<16x128xf32> -> vector<16x128xf32>
    %185 = arith.addf %182, %184 : vector<16x128xf32>
    %186 = arith.negf %185 : vector<16x128xf32>
    %187 = math.exp %186 : vector<16x128xf32>
    %cst_67 = arith.constant 1.000000e+00 : f32
    %188 = vector.broadcast %cst_67 : f32 to vector<16x128xf32>
    %189 = arith.addf %188, %187 : vector<16x128xf32>
    %190 = arith.divf %188, %189 : vector<16x128xf32>
    %191 = math.tanh %185 : vector<16x128xf32>
    %c96_i32_68 = arith.constant 96 : i32
    %192 = tpu.dynamic_rotate %190 by %c96_i32_68 dim 1 : vector<16x128xf32>, i32 -> vector<16x128xf32>
    %c64_i32_69 = arith.constant 64 : i32
    %193 = tpu.dynamic_rotate %191 by %c64_i32_69 dim 1 : vector<16x128xf32>, i32 -> vector<16x128xf32>
    %c32_i32_70 = arith.constant 32 : i32
    %194 = tpu.dynamic_rotate %190 by %c32_i32_70 dim 1 : vector<16x128xf32>, i32 -> vector<16x128xf32>
    %195 = arith.mulf %192, %173 : vector<16x128xf32>
    %196 = arith.mulf %190, %193 : vector<16x128xf32>
    %197 = arith.addf %195, %196 : vector<16x128xf32>
    %198 = math.tanh %197 : vector<16x128xf32>
    %199 = arith.mulf %194, %198 : vector<16x128xf32>
    %200 = arith.truncf %199 : vector<16x128xf32> to vector<16x128xbf16>
    %201 = arith.index_cast %180 : i32 to index
    %c0_71 = arith.constant 0 : index
    %202 = vector.load %arg11[%201, %c0_71] : memref<128x128xbf16, #tpu.memory_space<vmem>>, vector<16x128xbf16>
    tpu.vector_store %arg11[%201, %c0_71], %200 {strides = array<i32>} : memref<128x128xbf16, #tpu.memory_space<vmem>>, vector<16x128xbf16>,
    %c8_i32 = arith.constant 8 : i32
    %c0_72 = arith.constant 0 : index
    %c0_73 = arith.constant 0 : index
    %203 = vector.load %arg11[%c0_72, %c0_73] : memref<128x128xbf16, #tpu.memory_space<vmem>>, vector<128x128xbf16>
    %c0_74 = arith.constant 0 : index
    %c0_75 = arith.constant 0 : index
    %204 = vector.load %arg5[%c0_74, %c0_75] : memref<128x128xbf16, #tpu.memory_space<vmem>>, vector<128x128xbf16>
    %cst_76 = arith.constant dense<0.000000e+00> : vector<128x128xf32>
    %205 = tpu.matmul %203, %204, %cst_76 {dimension_numbers = #tpu.dot_dimension_numbers<[1], [0], [0], [1], [0, 0, 1, 1], [], []>} : vector<128x128xbf16>, vector<128x128xbf16>, vector<128x128xf32> -> vector<128x128xf32>
    %c0_77 = arith.constant 0 : index
    %c0_78 = arith.constant 0 : index
    %206 = vector.load %arg7[%c0_77, %c0_78] : memref<1x128xf32, #tpu.memory_space<vmem>>, vector<1x128xf32>
    %207 = vector.broadcast %206 : vector<1x128xf32> to vector<128x128xf32>
    %208 = arith.addf %205, %207 : vector<128x128xf32>
    %c0_79 = arith.constant 0 : index
    %c0_80 = arith.constant 0 : index
    %209 = vector.load %arg12[%c0_79, %c0_80] : memref<128x128xf32, #tpu.memory_space<vmem>>, vector<128x128xf32>
    tpu.vector_store %arg12[%c0_79, %c0_80], %208 {strides = array<i32>} : memref<128x128xf32, #tpu.memory_space<vmem>>, vector<128x128xf32>,
    %c0_81 = arith.constant 0 : index
    %c0_82 = arith.constant 0 : index
    %210 = vector.load %arg6[%c0_81, %c0_82] : memref<128x128xbf16, #tpu.memory_space<vmem>>, vector<128x128xbf16>
    %cst_83 = arith.constant 0.000000e+00 : f32
    %211 = vector.broadcast %cst_83 : f32 to vector<16x128xf32>
    %cst_84 = arith.constant 0.000000e+00 : f32
    %212 = vector.broadcast %cst_84 : f32 to vector<16x128xf32>
    %c0_i32_85 = arith.constant 0 : i32
    %c16_i32_86 = arith.constant 16 : i32
    %213 = arith.muli %c0_i32_85, %c16_i32_86 : i32
    %214 = tpu.assume_multiple %213, 16 : i32
    %215 = arith.index_cast %214 : i32 to index
    %c0_87 = arith.constant 0 : index
    %216 = vector.load %arg12[%215, %c0_87] : memref<128x128xf32, #tpu.memory_space<vmem>>, vector<16x128xf32>
    %217 = arith.truncf %211 : vector<16x128xf32> to vector<16x128xbf16>
    %cst_88 = arith.constant dense<0.000000e+00> : vector<16x128xf32>
    %218 = tpu.matmul %217, %210, %cst_88 {dimension_numbers = #tpu.dot_dimension_numbers<[1], [0], [0], [1], [0, 0, 1, 1], [], []>} : vector<16x128xbf16>, vector<128x128xbf16>, vector<16x128xf32> -> vector<16x128xf32>
    %219 = arith.addf %216, %218 : vector<16x128xf32>
    %220 = arith.negf %219 : vector<16x128xf32>
    %221 = math.exp %220 : vector<16x128xf32>
    %cst_89 = arith.constant 1.000000e+00 : f32
    %222 = vector.broadcast %cst_89 : f32 to vector<16x128xf32>
    %223 = arith.addf %222, %221 : vector<16x128xf32>
    %224 = arith.divf %222, %223 : vector<16x128xf32>
    %225 = math.tanh %219 : vector<16x128xf32>
    %c96_i32_90 = arith.constant 96 : i32
    %226 = tpu.dynamic_rotate %224 by %c96_i32_90 dim 1 : vector<16x128xf32>, i32 -> vector<16x128xf32>
    %c64_i32_91 = arith.constant 64 : i32
    %227 = tpu.dynamic_rotate %225 by %c64_i32_91 dim 1 : vector<16x128xf32>, i32 -> vector<16x128xf32>
    %c32_i32_92 = arith.constant 32 : i32
    %228 = tpu.dynamic_rotate %224 by %c32_i32_92 dim 1 : vector<16x128xf32>, i32 -> vector<16x128xf32>
    %229 = arith.mulf %226, %212 : vector<16x128xf32>
    %230 = arith.mulf %224, %227 : vector<16x128xf32>
    %231 = arith.addf %229, %230 : vector<16x128xf32>
    %232 = math.tanh %231 : vector<16x128xf32>
    %233 = arith.mulf %228, %232 : vector<16x128xf32>
    %c1_i32_93 = arith.constant 1 : i32
    %c16_i32_94 = arith.constant 16 : i32
    %234 = arith.muli %c1_i32_93, %c16_i32_94 : i32
    %235 = tpu.assume_multiple %234, 16 : i32
    %236 = arith.index_cast %235 : i32 to index
    %c0_95 = arith.constant 0 : index
    %237 = vector.load %arg12[%236, %c0_95] : memref<128x128xf32, #tpu.memory_space<vmem>>, vector<16x128xf32>
    %238 = arith.truncf %233 : vector<16x128xf32> to vector<16x128xbf16>
    %cst_96 = arith.constant dense<0.000000e+00> : vector<16x128xf32>
    %239 = tpu.matmul %238, %210, %cst_96 {dimension_numbers = #tpu.dot_dimension_numbers<[1], [0], [0], [1], [0, 0, 1, 1], [], []>} : vector<16x128xbf16>, vector<128x128xbf16>, vector<16x128xf32> -> vector<16x128xf32>
    %240 = arith.addf %237, %239 : vector<16x128xf32>
    %241 = arith.negf %240 : vector<16x128xf32>
    %242 = math.exp %241 : vector<16x128xf32>
    %cst_97 = arith.constant 1.000000e+00 : f32
    %243 = vector.broadcast %cst_97 : f32 to vector<16x128xf32>
    %244 = arith.addf %243, %242 : vector<16x128xf32>
    %245 = arith.divf %243, %244 : vector<16x128xf32>
    %246 = math.tanh %240 : vector<16x128xf32>
    %c96_i32_98 = arith.constant 96 : i32
    %247 = tpu.dynamic_rotate %245 by %c96_i32_98 dim 1 : vector<16x128xf32>, i32 -> vector<16x128xf32>
    %c64_i32_99 = arith.constant 64 : i32
    %248 = tpu.dynamic_rotate %246 by %c64_i32_99 dim 1 : vector<16x128xf32>, i32 -> vector<16x128xf32>
    %c32_i32_100 = arith.constant 32 : i32
    %249 = tpu.dynamic_rotate %245 by %c32_i32_100 dim 1 : vector<16x128xf32>, i32 -> vector<16x128xf32>
    %250 = arith.mulf %247, %231 : vector<16x128xf32>
    %251 = arith.mulf %245, %248 : vector<16x128xf32>
    %252 = arith.addf %250, %251 : vector<16x128xf32>
    %253 = math.tanh %252 : vector<16x128xf32>
    %254 = arith.mulf %249, %253 : vector<16x128xf32>
    %c2_i32_101 = arith.constant 2 : i32
    %c16_i32_102 = arith.constant 16 : i32
    %255 = arith.muli %c2_i32_101, %c16_i32_102 : i32
    %256 = tpu.assume_multiple %255, 16 : i32
    %257 = arith.index_cast %256 : i32 to index
    %c0_103 = arith.constant 0 : index
    %258 = vector.load %arg12[%257, %c0_103] : memref<128x128xf32, #tpu.memory_space<vmem>>, vector<16x128xf32>
    %259 = arith.truncf %254 : vector<16x128xf32> to vector<16x128xbf16>
    %cst_104 = arith.constant dense<0.000000e+00> : vector<16x128xf32>
    %260 = tpu.matmul %259, %210, %cst_104 {dimension_numbers = #tpu.dot_dimension_numbers<[1], [0], [0], [1], [0, 0, 1, 1], [], []>} : vector<16x128xbf16>, vector<128x128xbf16>, vector<16x128xf32> -> vector<16x128xf32>
    %261 = arith.addf %258, %260 : vector<16x128xf32>
    %262 = arith.negf %261 : vector<16x128xf32>
    %263 = math.exp %262 : vector<16x128xf32>
    %cst_105 = arith.constant 1.000000e+00 : f32
    %264 = vector.broadcast %cst_105 : f32 to vector<16x128xf32>
    %265 = arith.addf %264, %263 : vector<16x128xf32>
    %266 = arith.divf %264, %265 : vector<16x128xf32>
    %267 = math.tanh %261 : vector<16x128xf32>
    %c96_i32_106 = arith.constant 96 : i32
    %268 = tpu.dynamic_rotate %266 by %c96_i32_106 dim 1 : vector<16x128xf32>, i32 -> vector<16x128xf32>
    %c64_i32_107 = arith.constant 64 : i32
    %269 = tpu.dynamic_rotate %267 by %c64_i32_107 dim 1 : vector<16x128xf32>, i32 -> vector<16x128xf32>
    %c32_i32_108 = arith.constant 32 : i32
    %270 = tpu.dynamic_rotate %266 by %c32_i32_108 dim 1 : vector<16x128xf32>, i32 -> vector<16x128xf32>
    %271 = arith.mulf %268, %252 : vector<16x128xf32>
    %272 = arith.mulf %266, %269 : vector<16x128xf32>
    %273 = arith.addf %271, %272 : vector<16x128xf32>
    %274 = math.tanh %273 : vector<16x128xf32>
    %275 = arith.mulf %270, %274 : vector<16x128xf32>
    %c3_i32_109 = arith.constant 3 : i32
    %c16_i32_110 = arith.constant 16 : i32
    %276 = arith.muli %c3_i32_109, %c16_i32_110 : i32
    %277 = tpu.assume_multiple %276, 16 : i32
    %278 = arith.index_cast %277 : i32 to index
    %c0_111 = arith.constant 0 : index
    %279 = vector.load %arg12[%278, %c0_111] : memref<128x128xf32, #tpu.memory_space<vmem>>, vector<16x128xf32>
    %280 = arith.truncf %275 : vector<16x128xf32> to vector<16x128xbf16>
    %cst_112 = arith.constant dense<0.000000e+00> : vector<16x128xf32>
    %281 = tpu.matmul %280, %210, %cst_112 {dimension_numbers = #tpu.dot_dimension_numbers<[1], [0], [0], [1], [0, 0, 1, 1], [], []>} : vector<16x128xbf16>, vector<128x128xbf16>, vector<16x128xf32> -> vector<16x128xf32>
    %282 = arith.addf %279, %281 : vector<16x128xf32>
    %283 = arith.negf %282 : vector<16x128xf32>
    %284 = math.exp %283 : vector<16x128xf32>
    %cst_113 = arith.constant 1.000000e+00 : f32
    %285 = vector.broadcast %cst_113 : f32 to vector<16x128xf32>
    %286 = arith.addf %285, %284 : vector<16x128xf32>
    %287 = arith.divf %285, %286 : vector<16x128xf32>
    %288 = math.tanh %282 : vector<16x128xf32>
    %c96_i32_114 = arith.constant 96 : i32
    %289 = tpu.dynamic_rotate %287 by %c96_i32_114 dim 1 : vector<16x128xf32>, i32 -> vector<16x128xf32>
    %c64_i32_115 = arith.constant 64 : i32
    %290 = tpu.dynamic_rotate %288 by %c64_i32_115 dim 1 : vector<16x128xf32>, i32 -> vector<16x128xf32>
    %c32_i32_116 = arith.constant 32 : i32
    %291 = tpu.dynamic_rotate %287 by %c32_i32_116 dim 1 : vector<16x128xf32>, i32 -> vector<16x128xf32>
    %292 = arith.mulf %289, %273 : vector<16x128xf32>
    %293 = arith.mulf %287, %290 : vector<16x128xf32>
    %294 = arith.addf %292, %293 : vector<16x128xf32>
    %295 = math.tanh %294 : vector<16x128xf32>
    %296 = arith.mulf %291, %295 : vector<16x128xf32>
    %c4_i32_117 = arith.constant 4 : i32
    %c16_i32_118 = arith.constant 16 : i32
    %297 = arith.muli %c4_i32_117, %c16_i32_118 : i32
    %298 = tpu.assume_multiple %297, 16 : i32
    %299 = arith.index_cast %298 : i32 to index
    %c0_119 = arith.constant 0 : index
    %300 = vector.load %arg12[%299, %c0_119] : memref<128x128xf32, #tpu.memory_space<vmem>>, vector<16x128xf32>
    %301 = arith.truncf %296 : vector<16x128xf32> to vector<16x128xbf16>
    %cst_120 = arith.constant dense<0.000000e+00> : vector<16x128xf32>
    %302 = tpu.matmul %301, %210, %cst_120 {dimension_numbers = #tpu.dot_dimension_numbers<[1], [0], [0], [1], [0, 0, 1, 1], [], []>} : vector<16x128xbf16>, vector<128x128xbf16>, vector<16x128xf32> -> vector<16x128xf32>
    %303 = arith.addf %300, %302 : vector<16x128xf32>
    %304 = arith.negf %303 : vector<16x128xf32>
    %305 = math.exp %304 : vector<16x128xf32>
    %cst_121 = arith.constant 1.000000e+00 : f32
    %306 = vector.broadcast %cst_121 : f32 to vector<16x128xf32>
    %307 = arith.addf %306, %305 : vector<16x128xf32>
    %308 = arith.divf %306, %307 : vector<16x128xf32>
    %309 = math.tanh %303 : vector<16x128xf32>
    %c96_i32_122 = arith.constant 96 : i32
    %310 = tpu.dynamic_rotate %308 by %c96_i32_122 dim 1 : vector<16x128xf32>, i32 -> vector<16x128xf32>
    %c64_i32_123 = arith.constant 64 : i32
    %311 = tpu.dynamic_rotate %309 by %c64_i32_123 dim 1 : vector<16x128xf32>, i32 -> vector<16x128xf32>
    %c32_i32_124 = arith.constant 32 : i32
    %312 = tpu.dynamic_rotate %308 by %c32_i32_124 dim 1 : vector<16x128xf32>, i32 -> vector<16x128xf32>
    %313 = arith.mulf %310, %294 : vector<16x128xf32>
    %314 = arith.mulf %308, %311 : vector<16x128xf32>
    %315 = arith.addf %313, %314 : vector<16x128xf32>
    %316 = math.tanh %315 : vector<16x128xf32>
    %317 = arith.mulf %312, %316 : vector<16x128xf32>
    %c5_i32_125 = arith.constant 5 : i32
    %c16_i32_126 = arith.constant 16 : i32
    %318 = arith.muli %c5_i32_125, %c16_i32_126 : i32
    %319 = tpu.assume_multiple %318, 16 : i32
    %320 = arith.index_cast %319 : i32 to index
    %c0_127 = arith.constant 0 : index
    %321 = vector.load %arg12[%320, %c0_127] : memref<128x128xf32, #tpu.memory_space<vmem>>, vector<16x128xf32>
    %322 = arith.truncf %317 : vector<16x128xf32> to vector<16x128xbf16>
    %cst_128 = arith.constant dense<0.000000e+00> : vector<16x128xf32>
    %323 = tpu.matmul %322, %210, %cst_128 {dimension_numbers = #tpu.dot_dimension_numbers<[1], [0], [0], [1], [0, 0, 1, 1], [], []>} : vector<16x128xbf16>, vector<128x128xbf16>, vector<16x128xf32> -> vector<16x128xf32>
    %324 = arith.addf %321, %323 : vector<16x128xf32>
    %325 = arith.negf %324 : vector<16x128xf32>
    %326 = math.exp %325 : vector<16x128xf32>
    %cst_129 = arith.constant 1.000000e+00 : f32
    %327 = vector.broadcast %cst_129 : f32 to vector<16x128xf32>
    %328 = arith.addf %327, %326 : vector<16x128xf32>
    %329 = arith.divf %327, %328 : vector<16x128xf32>
    %330 = math.tanh %324 : vector<16x128xf32>
    %c96_i32_130 = arith.constant 96 : i32
    %331 = tpu.dynamic_rotate %329 by %c96_i32_130 dim 1 : vector<16x128xf32>, i32 -> vector<16x128xf32>
    %c64_i32_131 = arith.constant 64 : i32
    %332 = tpu.dynamic_rotate %330 by %c64_i32_131 dim 1 : vector<16x128xf32>, i32 -> vector<16x128xf32>
    %c32_i32_132 = arith.constant 32 : i32
    %333 = tpu.dynamic_rotate %329 by %c32_i32_132 dim 1 : vector<16x128xf32>, i32 -> vector<16x128xf32>
    %334 = arith.mulf %331, %315 : vector<16x128xf32>
    %335 = arith.mulf %329, %332 : vector<16x128xf32>
    %336 = arith.addf %334, %335 : vector<16x128xf32>
    %337 = math.tanh %336 : vector<16x128xf32>
    %338 = arith.mulf %333, %337 : vector<16x128xf32>
    %c6_i32_133 = arith.constant 6 : i32
    %c16_i32_134 = arith.constant 16 : i32
    %339 = arith.muli %c6_i32_133, %c16_i32_134 : i32
    %340 = tpu.assume_multiple %339, 16 : i32
    %341 = arith.index_cast %340 : i32 to index
    %c0_135 = arith.constant 0 : index
    %342 = vector.load %arg12[%341, %c0_135] : memref<128x128xf32, #tpu.memory_space<vmem>>, vector<16x128xf32>
    %343 = arith.truncf %338 : vector<16x128xf32> to vector<16x128xbf16>
    %cst_136 = arith.constant dense<0.000000e+00> : vector<16x128xf32>
    %344 = tpu.matmul %343, %210, %cst_136 {dimension_numbers = #tpu.dot_dimension_numbers<[1], [0], [0], [1], [0, 0, 1, 1], [], []>} : vector<16x128xbf16>, vector<128x128xbf16>, vector<16x128xf32> -> vector<16x128xf32>
    %345 = arith.addf %342, %344 : vector<16x128xf32>
    %346 = arith.negf %345 : vector<16x128xf32>
    %347 = math.exp %346 : vector<16x128xf32>
    %cst_137 = arith.constant 1.000000e+00 : f32
    %348 = vector.broadcast %cst_137 : f32 to vector<16x128xf32>
    %349 = arith.addf %348, %347 : vector<16x128xf32>
    %350 = arith.divf %348, %349 : vector<16x128xf32>
    %351 = math.tanh %345 : vector<16x128xf32>
    %c96_i32_138 = arith.constant 96 : i32
    %352 = tpu.dynamic_rotate %350 by %c96_i32_138 dim 1 : vector<16x128xf32>, i32 -> vector<16x128xf32>
    %c64_i32_139 = arith.constant 64 : i32
    %353 = tpu.dynamic_rotate %351 by %c64_i32_139 dim 1 : vector<16x128xf32>, i32 -> vector<16x128xf32>
    %c32_i32_140 = arith.constant 32 : i32
    %354 = tpu.dynamic_rotate %350 by %c32_i32_140 dim 1 : vector<16x128xf32>, i32 -> vector<16x128xf32>
    %355 = arith.mulf %352, %336 : vector<16x128xf32>
    %356 = arith.mulf %350, %353 : vector<16x128xf32>
    %357 = arith.addf %355, %356 : vector<16x128xf32>
    %358 = math.tanh %357 : vector<16x128xf32>
    %359 = arith.mulf %354, %358 : vector<16x128xf32>
    %c7_i32_141 = arith.constant 7 : i32
    %c16_i32_142 = arith.constant 16 : i32
    %360 = arith.muli %c7_i32_141, %c16_i32_142 : i32
    %361 = tpu.assume_multiple %360, 16 : i32
    %362 = arith.index_cast %361 : i32 to index
    %c0_143 = arith.constant 0 : index
    %363 = vector.load %arg12[%362, %c0_143] : memref<128x128xf32, #tpu.memory_space<vmem>>, vector<16x128xf32>
    %364 = arith.truncf %359 : vector<16x128xf32> to vector<16x128xbf16>
    %cst_144 = arith.constant dense<0.000000e+00> : vector<16x128xf32>
    %365 = tpu.matmul %364, %210, %cst_144 {dimension_numbers = #tpu.dot_dimension_numbers<[1], [0], [0], [1], [0, 0, 1, 1], [], []>} : vector<16x128xbf16>, vector<128x128xbf16>, vector<16x128xf32> -> vector<16x128xf32>
    %366 = arith.addf %363, %365 : vector<16x128xf32>
    %367 = arith.negf %366 : vector<16x128xf32>
    %368 = math.exp %367 : vector<16x128xf32>
    %cst_145 = arith.constant 1.000000e+00 : f32
    %369 = vector.broadcast %cst_145 : f32 to vector<16x128xf32>
    %370 = arith.addf %369, %368 : vector<16x128xf32>
    %371 = arith.divf %369, %370 : vector<16x128xf32>
    %372 = math.tanh %366 : vector<16x128xf32>
    %c96_i32_146 = arith.constant 96 : i32
    %373 = tpu.dynamic_rotate %371 by %c96_i32_146 dim 1 : vector<16x128xf32>, i32 -> vector<16x128xf32>
    %c64_i32_147 = arith.constant 64 : i32
    %374 = tpu.dynamic_rotate %372 by %c64_i32_147 dim 1 : vector<16x128xf32>, i32 -> vector<16x128xf32>
    %c32_i32_148 = arith.constant 32 : i32
    %375 = tpu.dynamic_rotate %371 by %c32_i32_148 dim 1 : vector<16x128xf32>, i32 -> vector<16x128xf32>
    %376 = arith.mulf %373, %357 : vector<16x128xf32>
    %377 = arith.mulf %371, %374 : vector<16x128xf32>
    %378 = arith.addf %376, %377 : vector<16x128xf32>
    %379 = math.tanh %378 : vector<16x128xf32>
    %380 = arith.mulf %375, %379 : vector<16x128xf32>
    %c8_i32_149 = arith.constant 8 : i32
    %381 = arith.truncf %380 : vector<16x128xf32> to vector<16x128xbf16>
    %c0_150 = arith.constant 0 : index
    %c0_151 = arith.constant 0 : index
    %382 = vector.load %arg8[%c0_150, %c0_151] : memref<128x128xbf16, #tpu.memory_space<vmem>>, vector<128x128xbf16>
    %cst_152 = arith.constant dense<0.000000e+00> : vector<16x128xf32>
    %383 = tpu.matmul %381, %382, %cst_152 {dimension_numbers = #tpu.dot_dimension_numbers<[1], [0], [0], [1], [0, 0, 1, 1], [], []>} : vector<16x128xbf16>, vector<128x128xbf16>, vector<16x128xf32> -> vector<16x128xf32>
    %c0_153 = arith.constant 0 : index
    %c0_154 = arith.constant 0 : index
    %384 = vector.load %arg9[%c0_153, %c0_154] : memref<1x128xf32, #tpu.memory_space<vmem>>, vector<1x128xf32>
    %385 = vector.broadcast %384 : vector<1x128xf32> to vector<16x128xf32>
    %386 = arith.addf %383, %385 : vector<16x128xf32>
    %c0_155 = arith.constant 0 : index
    %c0_156 = arith.constant 0 : index
    %387 = vector.load %arg10[%c0_155, %c0_156] : memref<16x128xf32, #tpu.memory_space<vmem>>, vector<16x128xf32>
    tpu.vector_store %arg10[%c0_155, %c0_156], %386 {strides = array<i32>} : memref<16x128xf32, #tpu.memory_space<vmem>>, vector<16x128xf32>,
    return
  }
  func.func @transform_0(%arg0: i32) -> (i32, i32, i32) {
    %c0_i32 = arith.constant 0 : i32
    %c0_i32_0 = arith.constant 0 : i32
    %c0_i32_1 = arith.constant 0 : i32
    return %c0_i32, %arg0, %c0_i32_0 : i32, i32, i32
  }
  func.func @transform_1(%arg0: i32) -> (i32, i32) {
    %c0_i32 = arith.constant 0 : i32
    %c0_i32_0 = arith.constant 0 : i32
    %c0_i32_1 = arith.constant 0 : i32
    return %c0_i32, %c0_i32_0 : i32, i32
  }
  func.func @transform_2(%arg0: i32) -> (i32, i32) {
    %c0_i32 = arith.constant 0 : i32
    %c0_i32_0 = arith.constant 0 : i32
    %c0_i32_1 = arith.constant 0 : i32
    return %c0_i32, %c0_i32_0 : i32, i32
  }
  func.func @transform_3(%arg0: i32) -> (i32, i32) {
    %c0_i32 = arith.constant 0 : i32
    %c0_i32_0 = arith.constant 0 : i32
    %c0_i32_1 = arith.constant 0 : i32
    return %c0_i32, %c0_i32_0 : i32, i32
  }
  func.func @transform_4(%arg0: i32) -> (i32, i32) {
    %c0_i32 = arith.constant 0 : i32
    %c0_i32_0 = arith.constant 0 : i32
    %c0_i32_1 = arith.constant 0 : i32
    return %c0_i32, %c0_i32_0 : i32, i32
  }
  func.func @transform_5(%arg0: i32) -> (i32, i32) {
    %c0_i32 = arith.constant 0 : i32
    %c0_i32_0 = arith.constant 0 : i32
    %c0_i32_1 = arith.constant 0 : i32
    return %c0_i32, %c0_i32_0 : i32, i32
  }
  func.func @transform_6(%arg0: i32) -> (i32, i32) {
    %c0_i32 = arith.constant 0 : i32
    %c0_i32_0 = arith.constant 0 : i32
    %c0_i32_1 = arith.constant 0 : i32
    return %c0_i32, %c0_i32_0 : i32, i32
  }
  func.func @transform_7(%arg0: i32) -> (i32, i32) {
    %c0_i32 = arith.constant 0 : i32
    %c0_i32_0 = arith.constant 0 : i32
    %c0_i32_1 = arith.constant 0 : i32
    return %c0_i32, %c0_i32_0 : i32, i32
  }
  func.func @transform_8(%arg0: i32) -> (i32, i32) {
    %c0_i32 = arith.constant 0 : i32
    %c0_i32_0 = arith.constant 0 : i32
    %c0_i32_1 = arith.constant 0 : i32
    return %c0_i32, %c0_i32_0 : i32, i32
  }
  func.func @transform_9(%arg0: i32) -> (i32, i32) {
    %c0_i32 = arith.constant 0 : i32
    %c0_i32_0 = arith.constant 0 : i32
    return %arg0, %c0_i32 : i32, i32
  }
}

</mosaic_0001>

<bundles_post_ra>
// kernel: stacked_lstm_forward.1
= control target key start
LH: loop header
LB: loop body
LE: loop exit
PB: predicated region body
PF: predicated region fallthrough
CT: control target
= control target key end

     0   :  { %14 = vsyncpa [#allocation5], 0  ;;  %s4194_s0 = inlined_call_operand.vmem [shape: bf16[8,16,128], index: 0, kind: input, shape index: {}]   ;;  %s4195_s1 = inlined_call_operand.vmem [shape: bf16[128,128], index: 1, kind: input, shape index: {}]   ;;  %s4196_s2 = inlined_call_operand.hbm [shape: bf16[128,128], index: 2, kind: input, shape index: {}]   ;;  %s4197_s3 = inlined_call_operand.vmem [shape: f32[1,128], index: 3, kind: input, shape index: {}]   ;;  %s4198_s4 = inlined_call_operand.hbm [shape: bf16[128,128], index: 4, kind: input, shape index: {}]   ;;  %s4199_s5 = inlined_call_operand.hbm [shape: bf16[128,128], index: 5, kind: input, shape index: {}]   ;;  %s4200_s6 = inlined_call_operand.vmem [shape: f32[1,128], index: 6, kind: input, shape index: {}]   ;;  %s4201_s7 = inlined_call_operand.hbm [shape: bf16[128,128], index: 7, kind: input, shape index: {}]   ;;  %s4202_s8 = inlined_call_operand.vmem [shape: f32[1,128], index: 8, kind: input, shape index: {}]   ;;  %s4203_s9 = inlined_call_operand.vmem [shape: f32[16,128], index: 9, kind: output, shape index: {}]  }
   0x1   :  { %15 = vsyncpa [#allocation7], 0 }
   0x2   :  { %16 = vsyncpa [#allocation10], 0  ;;  %s3397_s30 = smov [#allocation6]   ;;  %s3398_s11 = smov [#allocation4]  }
   0x3   :  { %s40_s10 = sshll.u32 %s3397_s30, 4  ;;  %s26_s12 = sshll.u32 %s3398_s11, 4  ;;  %s41_s10 = int_to_ptr.vmem [resolvable:$true] %s40_s10  ;;  %s27_s12 = int_to_ptr.vmem [resolvable:$true] %s26_s12 }
   0x4   :  { %s3319_s13 = scalar_lea.vmem %s41_s10, 1024  ;;  %p3324_p1 = scmp.lt.s32.totalorder %s41_s10, %s41_s10 }
   0x5   :  { %p3320_p0 = scmp.ne.s32.totalorder %s41_s10, %s3319_s13  ;;  %p3325_p2 = scmp.lt.s32.totalorder %s3319_s13, %s3319_s13 }
   0x7   :  { %p3326_p3 = por %p3325_p2, %p3324_p1 }
   0x9   :  { %p3327_p4 = pnand %p3326_p3, %p3320_p0 }
   0xb   :  { %3330 = shalt.err (!%p3327_p4)
}
   0xc   :  { %s3399_s14 = smov 64   ;;  %s3400_s15 = smov 4  }
   0xd   :  { %46 = dma.hbm_to_vmem [thread:$0]  %s4198_s4, 1024, %s41_s10, [#allocation7], %s3399_s14, %s3399_s14, %s3400_s15  }
   0xe   :  { %s3339_s18 = scalar_lea.vmem %s27_s12, 1024  ;;  %p3344_p6 = scmp.lt.s32.totalorder %s27_s12, %s27_s12 }
   0xf   :  { %p3340_p5 = scmp.ne.s32.totalorder %s27_s12, %s3339_s18  ;;  %p3345_p7 = scmp.lt.s32.totalorder %s3339_s18, %s3339_s18 }
  0x11   :  { %p3346_p8 = por %p3345_p7, %p3344_p6 }
  0x13   :  { %p3347_p9 = pnand %p3346_p8, %p3340_p5 }
  0x15   :  { %3350 = shalt.err (!%p3347_p9)
}
  0x16   :  { %32 = dma.hbm_to_vmem [thread:$0]  %s4196_s2, 1024, %s27_s12, [#allocation5], %s3399_s14, %s3399_s14, %s3400_s15  }
  0x17   :  { %s3401_s21 = smov [#allocation8]   ;;  %s3402_s23 = smov [#allocation9]  }
  0x18   :  { %s52_s22 = sshll.u32 %s3401_s21, 4  ;;  %s66_s24 = sshll.u32 %s3402_s23, 4  ;;  %s53_s22 = int_to_ptr.vmem [resolvable:$true] %s52_s22  ;;  %s67_s24 = int_to_ptr.vmem [resolvable:$true] %s66_s24 }
  0x19   :  { %s3359_s4 = scalar_lea.vmem %s53_s22, 1024  ;;  %p3364_p11 = scmp.lt.s32.totalorder %s53_s22, %s53_s22 }
  0x1a   :  { %p3360_p10 = scmp.ne.s32.totalorder %s53_s22, %s3359_s4  ;;  %p3365_p12 = scmp.lt.s32.totalorder %s3359_s4, %s3359_s4 }
  0x1c   :  { %p3366_p13 = por %p3365_p12, %p3364_p11 }
  0x1e   :  { %p3367_p0 = pnand %p3366_p13, %p3360_p10 }
  0x20   :  { %3370 = shalt.err (!%p3367_p0)
}
  0x21   :  { %58 = dma.hbm_to_vmem [thread:$0]  %s4199_s5, 1024, %s53_s22, [#allocation7], %s3399_s14, %s3399_s14, %s3400_s15  }
  0x22   :  { %s3379_s2 = scalar_lea.vmem %s67_s24, 1024  ;;  %p3384_p2 = scmp.lt.s32.totalorder %s67_s24, %s67_s24 }
  0x23   :  { %p3380_p1 = scmp.ne.s32.totalorder %s67_s24, %s3379_s2  ;;  %p3385_p3 = scmp.lt.s32.totalorder %s3379_s2, %s3379_s2 }
  0x25   :  { %p3386_p4 = por %p3385_p3, %p3384_p2 }
  0x27   :  { %p3387_p5 = pnand %p3386_p4, %p3380_p1 }
  0x29   :  { %3390 = shalt.err (!%p3387_p5)
}
  0x2a   :  { %72 = dma.hbm_to_vmem [thread:$0]  %s4201_s7, 1024, %s67_s24, [#allocation10], %s3399_s14, %s3399_s14, %s3400_s15  }
  0x2b   :  { %3391 = dma.done.wait [#allocation5], 1024  }
  0x2c   :  { %3392 = vsyncadd [#allocation5], 4294966272 }
  0x2d   :  { %3393 = dma.done.wait [#allocation7], 2048  }
  0x2e   :  { %3394 = vsyncadd [#allocation7], 4294965248 }
  0x2f   :  { %3395 = dma.done.wait [#allocation10], 1024  }
  0x30   :  { %3396 = vsyncadd [#allocation10], 4294966272  ;;  %v3403_v0 = vmov 0.0   ;;  %vm3404_vm0 = vmmov 0   ;;  %v2994_v1 = vld [vmem:[%s4195_s1 + $0x38] sm:$0xff]   ;;  %v2996_v3 = vld [vmem:[%s4195_s1 + $0x30] sm:$0xff]  }
  0x31   :  { %2611 = vmatprep.subr.bf16.mxu1 %v3403_v0  ;;  %2627 = vmatprep.mubr.msk.bf16.mxu1 %vm3404_vm0, %v3403_v0  ;;  %v3488_v2 = vld [vmem:[#allocation4 + $0x38] sm:$0xff]   ;;  %v3494_v4 = vld [vmem:[#allocation4 + $0x30] sm:$0xff]   ;;  %v2998_v5 = vld [vmem:[%s4195_s1 + $0x28] sm:$0xff]   ;;  %v3405_v19 = vmov 0   ;;  %s3406_s16 = smov 96   ;;  %s3407_s17 = smov 32  }
  0x32   :  { %2579 = vmatprep.subr.bf16.mxu0 %v2994_v1  ;;  %2612 = vmatpush3.bf16.msra.mxu1 %v3488_v2  ;;  %v3501_v6 = vld [vmem:[#allocation4 + $0x28] sm:$0xff]   ;;  %v3000_v7 = vld [vmem:[%s4195_s1 + $0x20] sm:$0xff]   ;;  %v3002_v9 = vld [vmem:[%s4195_s1 + $0x18] sm:$0xff]  }
  0x33   :  { %2580 = vmatpush3.bf16.msra.mxu0 %v2994_v1  ;;  %2613 = vmatprep.subr.bf16.mxu1 %v3403_v0  ;;  %v3508_v8 = vld [vmem:[#allocation4 + $0x20] sm:$0xff]   ;;  %v3514_v10 = vld [vmem:[#allocation4 + $0x18] sm:$0xff]   ;;  %v3004_v11 = vld [vmem:[%s4195_s1 + $0x10] sm:$0xff]  }
  0x34   :  { %2581 = vmatprep.subr.bf16.mxu0 %v2996_v3  ;;  %v3010_v12 = vld [vmem:[%s4194_s0] sm:$0xff]   ;;  %v3524_v13 = vld [vmem:[#allocation4 + $0x10] sm:$0xff]   ;;  %v3006_v14 = vld [vmem:[%s4195_s1 + $0x8] sm:$0xff]  }
  0x35   :  { %2595 = vmatprep.mubr.bf16.mxu0 %v3010_v12  ;;  %v3531_v15 = vld [vmem:[#allocation4 + $0x8] sm:$0xff]   ;;  %v3008_v16 = vld [vmem:[%s4195_s1] sm:$0xff]   ;;  %v3012_v35 = vld [vmem:[%s4194_s0 + $0x10] sm:$0xff]  }
  0x36   :  { %2614 = vmatpush3.bf16.msra.mxu1 %v3494_v4  ;;  %v3538_v17 = vld [vmem:[#allocation4] sm:$0xff]   ;;  %v3011_v18 = vld [vmem:[%s4194_s0 + $0x8] sm:$0xff]   ;;  %v3013_v36 = vld [vmem:[%s4194_s0 + $0x18] sm:$0xff]  }
  0x37   :  { %2582 = vmatpush3.bf16.msra.mxu0 %v2996_v3  ;;  %2615 = vmatprep.subr.bf16.mxu1 %v3403_v0  ;;  %v3588_v22 = vld [vmem:[%s4197_s3] ss:$0 sm:$0xff]  ;;  %v3015_v44 = vld [vmem:[%s4194_s0 + $0x28] sm:$0xff]   ;;  %v3016_v45 = vld [vmem:[%s4194_s0 + $0x30] sm:$0xff]  }
  0x38   :  { %2583 = vmatprep.subr.bf16.mxu0 %v2998_v5  ;;  %v3014_v43 = vld [vmem:[%s4194_s0 + $0x20] sm:$0xff]   ;;  %v3017_v46 = vld [vmem:[%s4194_s0 + $0x38] sm:$0xff]  }
  0x3a   :  { %2616 = vmatpush3.bf16.msra.mxu1 %v3501_v6 }
  0x3b   :  { %2584 = vmatpush3.bf16.msra.mxu0 %v2998_v5  ;;  %2617 = vmatprep.subr.bf16.mxu1 %v3403_v0 }
  0x3c   :  { %2585 = vmatprep.subr.bf16.mxu0 %v3000_v7 }
  0x3e   :  { %2618 = vmatpush3.bf16.msra.mxu1 %v3508_v8 }
  0x3f   :  { %2586 = vmatpush3.bf16.msra.mxu0 %v3000_v7  ;;  %2619 = vmatprep.subr.bf16.mxu1 %v3403_v0 }
  0x40   :  { %2587 = vmatprep.subr.bf16.mxu0 %v3002_v9 }
  0x42   :  { %2620 = vmatpush3.bf16.msra.mxu1 %v3514_v10 }
  0x43   :  { %2588 = vmatpush3.bf16.msra.mxu0 %v3002_v9  ;;  %2621 = vmatprep.subr.bf16.mxu1 %v3403_v0 }
  0x44   :  { %2589 = vmatprep.subr.bf16.mxu0 %v3004_v11 }
  0x46   :  { %2622 = vmatpush3.bf16.msra.mxu1 %v3524_v13 }
  0x47   :  { %2590 = vmatpush3.bf16.msra.mxu0 %v3004_v11  ;;  %2623 = vmatprep.subr.bf16.mxu1 %v3403_v0 }
  0x48   :  { %2591 = vmatprep.subr.bf16.mxu0 %v3006_v14 }
  0x4a   :  { %2624 = vmatpush3.bf16.msra.mxu1 %v3531_v15 }
  0x4b   :  { %2592 = vmatpush3.bf16.msra.mxu0 %v3006_v14  ;;  %2625 = vmatprep.subr.bf16.mxu1 %v3403_v0 }
  0x4c   :  { %2593 = vmatprep.subr.bf16.mxu0 %v3008_v16 }
  0x4e   :  { %2626 = vmatpush3.bf16.msra.mxu1 %v3538_v17 }
  0x4f   :  { %2594 = vmatpush3.bf16.msra.mxu0 %v3008_v16  ;;  %2651 = vmatprep.subr.bf16.mxu1 %v3403_v0 }
  0x50   :  { %2631 = vmatprep.subr.bf16.mxu0 %v3403_v0 }
  0x51   :  { %2628 = vmatmul.mubr.bf16.vlgmr.msra.gmra.mxu1 %v3405_v19 }
  0x52   :  { %2596 = vmatmul.mubr.bf16.vlgmr.msra.gmra.mxu0 %v3011_v18  ;;  %2652 = vmatpush3.bf16.msra.mxu1 %v3488_v2 }
  0x53   :  { %2632 = vmatpush3.bf16.msra.mxu0 %v3488_v2  ;;  %2653 = vmatprep.subr.bf16.mxu1 %v3403_v0 }
  0x54   :  { %2633 = vmatprep.subr.bf16.mxu0 %v3403_v0  ;;  %2667 = vmatprep.mubr.msk.bf16.mxu1 %vm3404_vm0, %v3403_v0 }
  0x55   :  { %2599 = vmatprep.mubr.bf16.mxu0 %v3012_v35 }
  0x56   :  { %2654 = vmatpush3.bf16.msra.mxu1 %v3494_v4 }
  0x57   :  { %2634 = vmatpush3.bf16.msra.mxu0 %v3494_v4  ;;  %2655 = vmatprep.subr.bf16.mxu1 %v3403_v0 }
  0x58   :  { %2635 = vmatprep.subr.bf16.mxu0 %v3403_v0 }
  0x5a   :  { %2656 = vmatpush3.bf16.msra.mxu1 %v3501_v6  ;;  %2600 = vmatmul.mubr.bf16.gmra.mxu0 %v3013_v36 }
  0x5b   :  { %2636 = vmatpush3.bf16.msra.mxu0 %v3501_v6  ;;  %2657 = vmatprep.subr.bf16.mxu1 %v3403_v0 }
  0x5c   :  { %2637 = vmatprep.subr.bf16.mxu0 %v3403_v0  ;;  %2603 = vmatprep.mubr.bf16.mxu0 %v3014_v43 }
  0x5e   :  { %2658 = vmatpush3.bf16.msra.mxu1 %v3508_v8 }
  0x5f   :  { %2638 = vmatpush3.bf16.msra.mxu0 %v3508_v8  ;;  %2659 = vmatprep.subr.bf16.mxu1 %v3403_v0 }
  0x60   :  { %2639 = vmatprep.subr.bf16.mxu0 %v3403_v0 }
  0x62   :  { %2660 = vmatpush3.bf16.msra.mxu1 %v3514_v10  ;;  %2604 = vmatmul.mubr.bf16.gmra.mxu0 %v3015_v44 }
  0x63   :  { %2640 = vmatpush3.bf16.msra.mxu0 %v3514_v10  ;;  %2661 = vmatprep.subr.bf16.mxu1 %v3403_v0 }
  0x64   :  { %2641 = vmatprep.subr.bf16.mxu0 %v3403_v0  ;;  %2607 = vmatprep.mubr.bf16.mxu0 %v3016_v45 }
  0x66   :  { %2662 = vmatpush3.bf16.msra.mxu1 %v3524_v13 }
  0x67   :  { %2642 = vmatpush3.bf16.msra.mxu0 %v3524_v13  ;;  %2663 = vmatprep.subr.bf16.mxu1 %v3403_v0 }
  0x68   :  { %2643 = vmatprep.subr.bf16.mxu0 %v3403_v0 }
  0x6a   :  { %2664 = vmatpush3.bf16.msra.mxu1 %v3531_v15  ;;  %2608 = vmatmul.mubr.bf16.gmra.mxu0 %v3017_v46 }
  0x6b   :  { %2644 = vmatpush3.bf16.msra.mxu0 %v3531_v15  ;;  %2665 = vmatprep.subr.bf16.mxu1 %v3403_v0 }
  0x6c   :  { %2645 = vmatprep.subr.bf16.mxu0 %v3403_v0  ;;  %2647 = vmatprep.mubr.msk.bf16.mxu0 %vm3404_vm0, %v3403_v0 }
  0x6e   :  { %2666 = vmatpush3.bf16.msra.mxu1 %v3538_v17 }
  0x6f   :  { %2646 = vmatpush3.bf16.msra.mxu0 %v3538_v17  ;;  %2691 = vmatprep.subr.bf16.mxu1 %v3403_v0 }
  0x70   :  { %2671 = vmatprep.subr.bf16.mxu0 %v3403_v0 }
 0x111   :  { %v436_v20 = vpop.f32.mrf.mxu1 }
 0x112   :  { %v3583_v21 = vpop.f32.mrf.mxu0 }
 0x113   :  { %v2629_v23 = vpop.f32.mrf.mxu1 }
 0x114   :  { %v257_v24 = vpop.f32.mrf.mxu0 }
 0x115   :  { %v258_v25 = vadd.f32 %v3588_v22, %v257_v24  ;;  %v439_v26 = vpop.f32.mrf.mxu1 }
 0x116   :  { %v3591_v27 = vpop.f32.mrf.mxu0 }
 0x117   :  { %v443_v28 = vadd.f32 %v436_v20, %v258_v25  ;;  %v2630_v29 = vpop.f32.mrf.mxu1 }
 0x118   :  { %v260_v30 = vpop.f32.mrf.mxu0 }
 0x119   :  { %v2256_v31 = vmul.f32 -1.442695, %v443_v28  ;;  %v261_v32 = vadd.f32 %v3588_v22, %v260_v30  ;;  %3050 = vtanh.f32 %v443_v28 }
 0x11a   :  { %v3644_v5 = vpop.f32.mrf.mxu0 }
 0x11b   :  { %3052 = vpow2.f32 %v2256_v31  ;;  %v444_v33 = vadd.f32 %v439_v26, %v261_v32  ;;  %v266_v26 = vadd.f32 %v3583_v21, %v3588_v22  ;;  %v269_v31 = vadd.f32 %v3591_v27, %v3588_v22 }
 0x11c   :  { %v3646_v7 = vpop.f32.mrf.mxu0 }
 0x11d   :  { %v2257_v34 = vmul.f32 -1.442695, %v444_v33  ;;  %3054 = vtanh.f32 %v444_v33 }
 0x11e   :  { %v3648_v9 = vpop.f32.mrf.mxu0 }
 0x11f   :  { %3056 = vpow2.f32 %v2257_v34 }
 0x120   :  { %v3650_v11 = vpop.f32.mrf.mxu0 }
 0x122   :  { %v3652_v12 = vpop.f32.mrf.mxu0 }
 0x124   :  { %v3654_v14 = vpop.f32.mrf.mxu0 }
 0x126   :  { %v3051_v37 = vpop.eup %3050  ;;  %v3656_v16 = vpop.f32.mrf.mxu0 }
 0x127   :  { %463 = vrot.lane.b32.xlu1 %v3051_v37, %s3399_s14 }
 0x128   :  { %v3053_v38 = vpop.eup %3052  ;;  %v3658_v18 = vpop.f32.mrf.mxu0 }
 0x129   :  { %v451_v39 = vadd.f32 1.0, %v3053_v38 }
 0x12a   :  { %v3055_v40 = vpop.eup %3054  ;;  %v3660_v20 = vpop.f32.mrf.mxu0 }
 0x12b   :  { %3058 = vrcp.f32 %v451_v39  ;;  %465 = vrot.lane.b32.xlu1 %v3055_v40, %s3399_s14 }
 0x12c   :  { %v3057_v41 = vpop.eup %3056  ;;  %v3662_v23 = vpop.f32.mrf.mxu0 }
 0x12d   :  { %v452_v42 = vadd.f32 1.0, %v3057_v41 }
 0x12e   :  { %v3664_v24 = vpop.f32.mrf.mxu0 }
 0x12f   :  { %3060 = vrcp.f32 %v452_v42 }
 0x130   :  { %v3666_v25 = vpop.f32.mrf.mxu0 }
 0x138   :  { %v3059_v47 = vpop.eup %3058 }
 0x139   :  { %459 = vrot.lane.b32.xlu0 %v3059_v47, %s3406_s16 }
 0x13c   :  { %v3061_v48 = vpop.eup %3060 }
 0x13d   :  { %469 = vrot.lane.b32.xlu1 %v3061_v48, %s3407_s17  ;;  %461 = vrot.lane.b32.xlu0 %v3061_v48, %s3406_s16 }
 0x141   :  { %467 = vrot.lane.b32.xlu0 %v3059_v47, %s3407_s17 }
 0x199   :  { %v464_v49 = vpop.permute.xlu1 %463 }
 0x19a   :  { %v473_v51 = vmul.f32 %v3059_v47, %v464_v49 }
 0x19d   :  { %v466_v53 = vpop.permute.xlu1 %465 }
 0x19e   :  { %v474_v56 = vmul.f32 %v3061_v48, %v466_v53 }
 0x1ab   :  { %v460_v50 = vpop.permute.xlu0 %459 }
 0x1ac   :  { %v471_v52 = vmul.f32 0.0, %v460_v50 }
 0x1ae   :  { %v3620_v54 = vadd.f32 %v473_v51, %v471_v52 }
 0x1af   :  { %v462_v55 = vpop.permute.xlu0 %461  ;;  %v470_v61 = vpop.permute.xlu1 %469 }
 0x1b0   :  { %v472_v57 = vmul.f32 0.0, %v462_v55  ;;  %3062 = vtanh.f32 %v3620_v54 }
 0x1b2   :  { %v3623_v58 = vadd.f32 %v474_v56, %v472_v57 }
 0x1b3   :  { %v468_v62 = vpop.permute.xlu0 %467 }
 0x1b4   :  { %3064 = vtanh.f32 %v3623_v58 }
 0x1bd   :  { %v3063_v59 = vpop.eup %3062 }
 0x1be   :  { %v479_v1 = vmul.f32 %v3063_v59, %v468_v62 }
 0x1c1   :  { %v3065_v60 = vpop.eup %3064 }
 0x1c2   :  { %v480_v63 = vmul.f32 %v3065_v60, %v470_v61 }
 0x1c4   :  { %v481_v3 = vpack.c.bf16 %v480_v63, %v479_v1  ;;  %v277_v1 = vadd.f32 %v3588_v22, %v3650_v11 }
 0x1c6   :  { %2358 = vst [vmem:[#allocation2] sm:$0xff] %v481_v3   ;;  %2648 = vmatmul.mubr.bf16.vlgmr.msra.gmra.mxu0 %v481_v3 }
 0x1c7   :  { %2672 = vmatpush3.bf16.msra.mxu0 %v3488_v2  ;;  %2687 = vmatprep.mubr.msk.bf16.mxu0 %vm3404_vm0, %v3403_v0 }
 0x1c8   :  { %2673 = vmatprep.subr.bf16.mxu0 %v3403_v0 }
 0x1cb   :  { %2674 = vmatpush3.bf16.msra.mxu0 %v3494_v4 }
 0x1cc   :  { %2675 = vmatprep.subr.bf16.mxu0 %v3403_v0 }
 0x1cf   :  { %2676 = vmatpush3.bf16.msra.mxu0 %v3501_v6 }
 0x1d0   :  { %2677 = vmatprep.subr.bf16.mxu0 %v3403_v0 }
 0x1d3   :  { %2678 = vmatpush3.bf16.msra.mxu0 %v3508_v8 }
 0x1d4   :  { %2679 = vmatprep.subr.bf16.mxu0 %v3403_v0 }
 0x1d7   :  { %2680 = vmatpush3.bf16.msra.mxu0 %v3514_v10 }
 0x1d8   :  { %2681 = vmatprep.subr.bf16.mxu0 %v3403_v0 }
 0x1db   :  { %2682 = vmatpush3.bf16.msra.mxu0 %v3524_v13 }
 0x1dc   :  { %2683 = vmatprep.subr.bf16.mxu0 %v3403_v0 }
 0x1df   :  { %2684 = vmatpush3.bf16.msra.mxu0 %v3531_v15 }
 0x1e0   :  { %2685 = vmatprep.subr.bf16.mxu0 %v3403_v0 }
 0x1e3   :  { %2686 = vmatpush3.bf16.msra.mxu0 %v3538_v17 }
 0x1e4   :  { %2711 = vmatprep.subr.bf16.mxu0 %v3403_v0 }
 0x286   :  { %v528_v28 = vpop.f32.mrf.mxu0 }
 0x287   :  { %v535_v29 = vadd.f32 %v528_v28, %v266_v26 }
 0x288   :  { %v2649_v30 = vpop.f32.mrf.mxu0 }
 0x289   :  { %v2260_v32 = vmul.f32 -1.442695, %v535_v29 }
 0x28a   :  { %v531_v33 = vpop.f32.mrf.mxu0 }
 0x28b   :  { %3066 = vpow2.f32 %v2260_v32  ;;  %v536_v34 = vadd.f32 %v531_v33, %v269_v31 }
 0x28c   :  { %v2650_v35 = vpop.f32.mrf.mxu0 }
 0x28d   :  { %v2261_v36 = vmul.f32 -1.442695, %v536_v34 }
 0x28f   :  { %3068 = vpow2.f32 %v2261_v36 }
 0x298   :  { %v3067_v37 = vpop.eup %3066 }
 0x299   :  { %v543_v38 = vadd.f32 1.0, %v3067_v37 }
 0x29b   :  { %3070 = vrcp.f32 %v543_v38 }
 0x29c   :  { %v3069_v39 = vpop.eup %3068  ;;  %3072 = vtanh.f32 %v535_v29 }
 0x29d   :  { %v544_v40 = vadd.f32 1.0, %v3069_v39 }
 0x29f   :  { %3074 = vrcp.f32 %v544_v40 }
 0x2a0   :  { %3076 = vtanh.f32 %v536_v34 }
 0x2a8   :  { %v3071_v21 = vpop.eup %3070 }
 0x2a9   :  { %551 = vrot.lane.b32.xlu0 %v3071_v21, %s3406_s16  ;;  %v3073_v41 = vpop.eup %3072 }
 0x2ac   :  { %v3075_v27 = vpop.eup %3074 }
 0x2ad   :  { %555 = vrot.lane.b32.xlu0 %v3073_v41, %s3399_s14  ;;  %553 = vrot.lane.b32.xlu1 %v3075_v27, %s3406_s16  ;;  %v3077_v42 = vpop.eup %3076 }
 0x2b1   :  { %559 = vrot.lane.b32.xlu0 %v3071_v21, %s3407_s17  ;;  %557 = vrot.lane.b32.xlu1 %v3077_v42, %s3399_s14 }
 0x2b5   :  { %561 = vrot.lane.b32.xlu1 %v3075_v27, %s3407_s17 }
 0x31b   :  { %v552_v43 = vpop.permute.xlu0 %551 }
 0x31c   :  { %v563_v46 = vmul.f32 %v552_v43, %v3620_v54 }
 0x31f   :  { %v556_v44 = vpop.permute.xlu0 %555  ;;  %v554_v45 = vpop.permute.xlu1 %553 }
 0x320   :  { %v565_v47 = vmul.f32 %v3071_v21, %v556_v44  ;;  %v564_v50 = vmul.f32 %v554_v45, %v3623_v58  ;;  %v274_v58 = vadd.f32 %v3588_v22, %v3646_v7 }
 0x322   :  { %v3679_v48 = vadd.f32 %v565_v47, %v563_v46 }
 0x323   :  { %v558_v49 = vpop.permute.xlu1 %557  ;;  %v560_v56 = vpop.permute.xlu0 %559 }
 0x324   :  { %v566_v51 = vmul.f32 %v3075_v27, %v558_v49  ;;  %3078 = vtanh.f32 %v3679_v48 }
 0x326   :  { %v3683_v52 = vadd.f32 %v566_v51, %v564_v50 }
 0x327   :  { %v562_v57 = vpop.permute.xlu1 %561 }
 0x328   :  { %3080 = vtanh.f32 %v3683_v52 }
 0x331   :  { %v3079_v53 = vpop.eup %3078 }
 0x332   :  { %v571_v59 = vmul.f32 %v3079_v53, %v560_v56 }
 0x335   :  { %v3081_v55 = vpop.eup %3080 }
 0x336   :  { %v572_v60 = vmul.f32 %v3081_v55, %v562_v57  ;;  %v285_v57 = vadd.f32 %v3648_v9, %v3588_v22 }
 0x338   :  { %v573_v54 = vpack.c.bf16 %v572_v60, %v571_v59 }
 0x33a   :  { %2363 = vst [vmem:[#allocation2 + $0x8] sm:$0xff] %v573_v54   ;;  %2668 = vmatmul.mubr.bf16.vlgmr.msra.gmra.mxu1 %v573_v54 }
 0x33b   :  { %2692 = vmatpush3.bf16.msra.mxu1 %v3488_v2  ;;  %2707 = vmatprep.mubr.msk.bf16.mxu1 %vm3404_vm0, %v3403_v0 }
 0x33c   :  { %2693 = vmatprep.subr.bf16.mxu1 %v3403_v0 }
 0x33f   :  { %2694 = vmatpush3.bf16.msra.mxu1 %v3494_v4 }
 0x340   :  { %2695 = vmatprep.subr.bf16.mxu1 %v3403_v0 }
 0x343   :  { %2696 = vmatpush3.bf16.msra.mxu1 %v3501_v6 }
 0x344   :  { %2697 = vmatprep.subr.bf16.mxu1 %v3403_v0 }
 0x347   :  { %2698 = vmatpush3.bf16.msra.mxu1 %v3508_v8 }
 0x348   :  { %2699 = vmatprep.subr.bf16.mxu1 %v3403_v0 }
 0x34b   :  { %2700 = vmatpush3.bf16.msra.mxu1 %v3514_v10 }
 0x34c   :  { %2701 = vmatprep.subr.bf16.mxu1 %v3403_v0 }
 0x34f   :  { %2702 = vmatpush3.bf16.msra.mxu1 %v3524_v13 }
 0x350   :  { %2703 = vmatprep.subr.bf16.mxu1 %v3403_v0 }
 0x353   :  { %2704 = vmatpush3.bf16.msra.mxu1 %v3531_v15 }
 0x354   :  { %2705 = vmatprep.subr.bf16.mxu1 %v3403_v0 }
 0x357   :  { %2706 = vmatpush3.bf16.msra.mxu1 %v3538_v17 }
 0x358   :  { %2731 = vmatprep.subr.bf16.mxu1 %v3403_v0 }
 0x3fa   :  { %v621_v61 = vpop.f32.mrf.mxu1 }
 0x3fb   :  { %v628_v62 = vadd.f32 %v621_v61, %v274_v58 }
 0x3fc   :  { %v2669_v63 = vpop.f32.mrf.mxu1 }
 0x3fd   :  { %v2264_v3 = vmul.f32 -1.442695, %v628_v62 }
 0x3fe   :  { %v624_v26 = vpop.f32.mrf.mxu1 }
 0x3ff   :  { %3082 = vpow2.f32 %v2264_v3  ;;  %v629_v28 = vadd.f32 %v624_v26, %v277_v1 }
 0x400   :  { %v2670_v29 = vpop.f32.mrf.mxu1 }
 0x401   :  { %v2265_v30 = vmul.f32 -1.442695, %v629_v28 }
 0x403   :  { %3084 = vpow2.f32 %v2265_v30 }
 0x40c   :  { %v3083_v31 = vpop.eup %3082 }
 0x40d   :  { %v636_v32 = vadd.f32 1.0, %v3083_v31 }
 0x40f   :  { %3086 = vrcp.f32 %v636_v32 }
 0x410   :  { %v3085_v33 = vpop.eup %3084  ;;  %3088 = vtanh.f32 %v628_v62 }
 0x411   :  { %v637_v34 = vadd.f32 1.0, %v3085_v33 }
 0x413   :  { %3090 = vrcp.f32 %v637_v34 }
 0x414   :  { %3092 = vtanh.f32 %v629_v28 }
 0x41c   :  { %v3087_v7 = vpop.eup %3086 }
 0x41d   :  { %644 = vrot.lane.b32.xlu0 %v3087_v7, %s3406_s16  ;;  %v3089_v35 = vpop.eup %3088 }
 0x420   :  { %v3091_v11 = vpop.eup %3090 }
 0x421   :  { %648 = vrot.lane.b32.xlu0 %v3089_v35, %s3399_s14  ;;  %646 = vrot.lane.b32.xlu1 %v3091_v11, %s3406_s16  ;;  %v3093_v36 = vpop.eup %3092 }
 0x425   :  { %652 = vrot.lane.b32.xlu0 %v3087_v7, %s3407_s17  ;;  %650 = vrot.lane.b32.xlu1 %v3093_v36, %s3399_s14 }
 0x429   :  { %654 = vrot.lane.b32.xlu1 %v3091_v11, %s3407_s17 }
 0x48f   :  { %v645_v37 = vpop.permute.xlu0 %644 }
 0x490   :  { %v656_v40 = vmul.f32 %v645_v37, %v3679_v48 }
 0x493   :  { %v649_v38 = vpop.permute.xlu0 %648  ;;  %v647_v39 = vpop.permute.xlu1 %646 }
 0x494   :  { %v658_v21 = vmul.f32 %v3087_v7, %v649_v38  ;;  %v657_v42 = vmul.f32 %v647_v39, %v3683_v52  ;;  %v282_v52 = vadd.f32 %v3644_v5, %v3588_v22 }
 0x496   :  { %v3715_v41 = vadd.f32 %v658_v21, %v656_v40 }
 0x497   :  { %v651_v27 = vpop.permute.xlu1 %650  ;;  %v653_v47 = vpop.permute.xlu0 %652 }
 0x498   :  { %v659_v43 = vmul.f32 %v3091_v11, %v651_v27  ;;  %3094 = vtanh.f32 %v3715_v41 }
 0x49a   :  { %v3719_v44 = vadd.f32 %v659_v43, %v657_v42  ;;  %v293_v42 = vadd.f32 %v3588_v22, %v3658_v18 }
 0x49b   :  { %v655_v49 = vpop.permute.xlu1 %654 }
 0x49c   :  { %3096 = vtanh.f32 %v3719_v44 }
 0x4a5   :  { %v3095_v45 = vpop.eup %3094 }
 0x4a6   :  { %v664_v50 = vmul.f32 %v3095_v45, %v653_v47 }
 0x4a9   :  { %v3097_v46 = vpop.eup %3096 }
 0x4aa   :  { %v665_v51 = vmul.f32 %v3097_v46, %v655_v49 }
 0x4ac   :  { %v666_v48 = vpack.c.bf16 %v665_v51, %v664_v50 }
 0x4ae   :  { %2368 = vst [vmem:[#allocation2 + $0x10] sm:$0xff] %v666_v48   ;;  %2688 = vmatmul.mubr.bf16.vlgmr.msra.gmra.mxu0 %v666_v48 }
 0x4af   :  { %2712 = vmatpush3.bf16.msra.mxu0 %v3488_v2  ;;  %2727 = vmatprep.mubr.msk.bf16.mxu0 %vm3404_vm0, %v3403_v0 }
 0x4b0   :  { %2713 = vmatprep.subr.bf16.mxu0 %v3403_v0 }
 0x4b3   :  { %2714 = vmatpush3.bf16.msra.mxu0 %v3494_v4 }
 0x4b4   :  { %2715 = vmatprep.subr.bf16.mxu0 %v3403_v0 }
 0x4b7   :  { %2716 = vmatpush3.bf16.msra.mxu0 %v3501_v6 }
 0x4b8   :  { %2717 = vmatprep.subr.bf16.mxu0 %v3403_v0 }
 0x4bb   :  { %2718 = vmatpush3.bf16.msra.mxu0 %v3508_v8 }
 0x4bc   :  { %2719 = vmatprep.subr.bf16.mxu0 %v3403_v0 }
 0x4bf   :  { %2720 = vmatpush3.bf16.msra.mxu0 %v3514_v10 }
 0x4c0   :  { %2721 = vmatprep.subr.bf16.mxu0 %v3403_v0 }
 0x4c3   :  { %2722 = vmatpush3.bf16.msra.mxu0 %v3524_v13 }
 0x4c4   :  { %2723 = vmatprep.subr.bf16.mxu0 %v3403_v0 }
 0x4c7   :  { %2724 = vmatpush3.bf16.msra.mxu0 %v3531_v15 }
 0x4c8   :  { %2725 = vmatprep.subr.bf16.mxu0 %v3403_v0 }
 0x4cb   :  { %2726 = vmatpush3.bf16.msra.mxu0 %v3538_v17 }
 0x4cc   :  { %2751 = vmatprep.subr.bf16.mxu0 %v3403_v0 }
 0x56e   :  { %v714_v53 = vpop.f32.mrf.mxu0 }
 0x56f   :  { %v721_v55 = vadd.f32 %v714_v53, %v282_v52 }
 0x570   :  { %v2689_v56 = vpop.f32.mrf.mxu0 }
 0x571   :  { %v2268_v59 = vmul.f32 -1.442695, %v721_v55 }
 0x572   :  { %v717_v60 = vpop.f32.mrf.mxu0 }
 0x573   :  { %3098 = vpow2.f32 %v2268_v59  ;;  %v722_v54 = vadd.f32 %v717_v60, %v285_v57 }
 0x574   :  { %v2690_v58 = vpop.f32.mrf.mxu0 }
 0x575   :  { %v2269_v61 = vmul.f32 -1.442695, %v722_v54 }
 0x577   :  { %3100 = vpow2.f32 %v2269_v61 }
 0x580   :  { %v3099_v62 = vpop.eup %3098 }
 0x581   :  { %v729_v63 = vadd.f32 1.0, %v3099_v62 }
 0x583   :  { %3102 = vrcp.f32 %v729_v63 }
 0x584   :  { %v3101_v1 = vpop.eup %3100  ;;  %3104 = vtanh.f32 %v721_v55 }
 0x585   :  { %v730_v3 = vadd.f32 1.0, %v3101_v1 }
 0x587   :  { %3106 = vrcp.f32 %v730_v3 }
 0x588   :  { %3108 = vtanh.f32 %v722_v54 }
 0x590   :  { %v3103_v5 = vpop.eup %3102 }
 0x591   :  { %737 = vrot.lane.b32.xlu0 %v3103_v5, %s3406_s16  ;;  %v3105_v26 = vpop.eup %3104 }
 0x594   :  { %v3107_v9 = vpop.eup %3106 }
 0x595   :  { %741 = vrot.lane.b32.xlu0 %v3105_v26, %s3399_s14  ;;  %739 = vrot.lane.b32.xlu1 %v3107_v9, %s3406_s16  ;;  %v3109_v28 = vpop.eup %3108 }
 0x599   :  { %745 = vrot.lane.b32.xlu0 %v3103_v5, %s3407_s17  ;;  %743 = vrot.lane.b32.xlu1 %v3109_v28, %s3399_s14 }
 0x59d   :  { %747 = vrot.lane.b32.xlu1 %v3107_v9, %s3407_s17 }
 0x603   :  { %v738_v29 = vpop.permute.xlu0 %737 }
 0x604   :  { %v749_v32 = vmul.f32 %v738_v29, %v3715_v41 }
 0x607   :  { %v742_v30 = vpop.permute.xlu0 %741  ;;  %v740_v31 = vpop.permute.xlu1 %739 }
 0x608   :  { %v751_v33 = vmul.f32 %v3103_v5, %v742_v30  ;;  %v750_v35 = vmul.f32 %v740_v31, %v3719_v44  ;;  %v3306_v30 = vld [vmem:[#allocation4 + $0x38] sm:$0xff]   ;;  %v3307_v31 = vld [vmem:[#allocation4 + $0x30] sm:$0xff]  }
 0x60a   :  { %v3751_v34 = vadd.f32 %v751_v33, %v749_v32  ;;  %v3308_v32 = vld [vmem:[#allocation4 + $0x28] sm:$0xff]   ;;  %v3309_v33 = vld [vmem:[#allocation4 + $0x20] sm:$0xff]  }
 0x60b   :  { %v744_v7 = vpop.permute.xlu1 %743  ;;  %v746_v39 = vpop.permute.xlu0 %745 }
 0x60c   :  { %v752_v11 = vmul.f32 %v3107_v9, %v744_v7  ;;  %3110 = vtanh.f32 %v3751_v34 }
 0x60e   :  { %v3755_v36 = vadd.f32 %v752_v11, %v750_v35  ;;  %v301_v11 = vadd.f32 %v3656_v16, %v3588_v22 }
 0x60f   :  { %v748_v40 = vpop.permute.xlu1 %747 }
 0x610   :  { %3112 = vtanh.f32 %v3755_v36 }
 0x619   :  { %v3111_v37 = vpop.eup %3110 }
 0x61a   :  { %v757_v21 = vmul.f32 %v3111_v37, %v746_v39 }
 0x61d   :  { %v3113_v38 = vpop.eup %3112 }
 0x61e   :  { %v758_v27 = vmul.f32 %v3113_v38, %v748_v40 }
 0x620   :  { %v759_v41 = vpack.c.bf16 %v758_v27, %v757_v21 }
 0x622   :  { %2373 = vst [vmem:[#allocation2 + $0x18] sm:$0xff] %v759_v41   ;;  %2708 = vmatmul.mubr.bf16.vlgmr.msra.gmra.mxu1 %v759_v41 }
 0x623   :  { %2732 = vmatpush3.bf16.msra.mxu1 %v3488_v2  ;;  %2747 = vmatprep.mubr.msk.bf16.mxu1 %vm3404_vm0, %v3403_v0  ;;  %v290_v2 = vadd.f32 %v3588_v22, %v3654_v14 }
 0x624   :  { %2733 = vmatprep.subr.bf16.mxu1 %v3403_v0 }
 0x627   :  { %2734 = vmatpush3.bf16.msra.mxu1 %v3494_v4 }
 0x628   :  { %2735 = vmatprep.subr.bf16.mxu1 %v3403_v0 }
 0x62b   :  { %2736 = vmatpush3.bf16.msra.mxu1 %v3501_v6 }
 0x62c   :  { %2737 = vmatprep.subr.bf16.mxu1 %v3403_v0 }
 0x62f   :  { %2738 = vmatpush3.bf16.msra.mxu1 %v3508_v8 }
 0x630   :  { %2739 = vmatprep.subr.bf16.mxu1 %v3403_v0 }
 0x633   :  { %2740 = vmatpush3.bf16.msra.mxu1 %v3514_v10 }
 0x634   :  { %2741 = vmatprep.subr.bf16.mxu1 %v3403_v0 }
 0x637   :  { %2742 = vmatpush3.bf16.msra.mxu1 %v3524_v13 }
 0x638   :  { %2743 = vmatprep.subr.bf16.mxu1 %v3403_v0 }
 0x63b   :  { %2744 = vmatpush3.bf16.msra.mxu1 %v3531_v15 }
 0x63c   :  { %2745 = vmatprep.subr.bf16.mxu1 %v3403_v0 }
 0x63f   :  { %2746 = vmatpush3.bf16.msra.mxu1 %v3538_v17 }
 0x6e2   :  { %v807_v4 = vpop.f32.mrf.mxu1 }
 0x6e3   :  { %v814_v6 = vadd.f32 %v807_v4, %v290_v2  ;;  %v3018_v2 = vld [vmem:[#allocation6 + $0x38] sm:$0xff]  }
 0x6e4   :  { %v2709_v8 = vpop.f32.mrf.mxu1  ;;  %2771 = vmatprep.subr.bf16.mxu1 %v3018_v2 }
 0x6e5   :  { %v2272_v43 = vmul.f32 -1.442695, %v814_v6 }
 0x6e6   :  { %v810_v44 = vpop.f32.mrf.mxu1 }
 0x6e7   :  { %3114 = vpow2.f32 %v2272_v43  ;;  %v815_v45 = vadd.f32 %v810_v44, %v293_v42 }
 0x6e8   :  { %v2710_v46 = vpop.f32.mrf.mxu1 }
 0x6e9   :  { %v2273_v47 = vmul.f32 -1.442695, %v815_v45 }
 0x6eb   :  { %3116 = vpow2.f32 %v2273_v47 }
 0x6f4   :  { %v3115_v49 = vpop.eup %3114 }
 0x6f5   :  { %v822_v50 = vadd.f32 1.0, %v3115_v49 }
 0x6f7   :  { %3118 = vrcp.f32 %v822_v50 }
 0x6f8   :  { %v3117_v51 = vpop.eup %3116  ;;  %3120 = vtanh.f32 %v814_v6 }
 0x6f9   :  { %v823_v48 = vadd.f32 1.0, %v3117_v51 }
 0x6fb   :  { %3122 = vrcp.f32 %v823_v48 }
 0x6fc   :  { %3124 = vtanh.f32 %v815_v45 }
 0x704   :  { %v3119_v14 = vpop.eup %3118 }
 0x705   :  { %830 = vrot.lane.b32.xlu0 %v3119_v14, %s3406_s16  ;;  %v3121_v52 = vpop.eup %3120 }
 0x708   :  { %v3123_v18 = vpop.eup %3122 }
 0x709   :  { %834 = vrot.lane.b32.xlu0 %v3121_v52, %s3399_s14  ;;  %832 = vrot.lane.b32.xlu1 %v3123_v18, %s3406_s16  ;;  %v3125_v53 = vpop.eup %3124 }
 0x70d   :  { %838 = vrot.lane.b32.xlu0 %v3119_v14, %s3407_s17  ;;  %836 = vrot.lane.b32.xlu1 %v3125_v53, %s3399_s14 }
 0x711   :  { %840 = vrot.lane.b32.xlu1 %v3123_v18, %s3407_s17 }
 0x777   :  { %v831_v55 = vpop.permute.xlu0 %830 }
 0x778   :  { %v842_v59 = vmul.f32 %v831_v55, %v3751_v34  ;;  %v298_v34 = vadd.f32 %v3652_v12, %v3588_v22  ;;  %v3020_v55 = vld [vmem:[#allocation6 + $0x30] sm:$0xff]  }
 0x77b   :  { %v835_v56 = vpop.permute.xlu0 %834  ;;  %v833_v57 = vpop.permute.xlu1 %832 }
 0x77c   :  { %v844_v60 = vmul.f32 %v3119_v14, %v835_v56  ;;  %v843_v61 = vmul.f32 %v833_v57, %v3755_v36  ;;  %v3019_v56 = vld [vmem:[#allocation2] sm:$0xff]   ;;  %v3021_v57 = vld [vmem:[#allocation6 + $0x28] sm:$0xff]  }
 0x77e   :  { %v3786_v54 = vadd.f32 %v844_v60, %v842_v59  ;;  %v3022_v59 = vld [vmem:[#allocation6 + $0x20] sm:$0xff]   ;;  %v3023_v60 = vld [vmem:[#allocation6 + $0x18] sm:$0xff]  }
 0x77f   :  { %v837_v58 = vpop.permute.xlu1 %836  ;;  %v839_v5 = vpop.permute.xlu0 %838 }
 0x780   :  { %v845_v62 = vmul.f32 %v3123_v18, %v837_v58  ;;  %3126 = vtanh.f32 %v3786_v54  ;;  %v3025_v58 = vld [vmem:[#allocation6 + $0x8] sm:$0xff]  }
 0x782   :  { %v3790_v63 = vadd.f32 %v845_v62, %v843_v61  ;;  %v3026_v61 = vld [vmem:[#allocation6] sm:$0xff]   ;;  %v3027_v62 = vld [vmem:[#allocation2 + $0x8] sm:$0xff]  }
 0x783   :  { %v841_v26 = vpop.permute.xlu1 %840 }
 0x784   :  { %3128 = vtanh.f32 %v3790_v63 }
 0x78d   :  { %v3127_v1 = vpop.eup %3126 }
 0x78e   :  { %v850_v9 = vmul.f32 %v3127_v1, %v839_v5  ;;  %v3029_v1 = vld [vmem:[#allocation2 + $0x18] sm:$0xff]  }
 0x791   :  { %v3129_v3 = vpop.eup %3128 }
 0x792   :  { %v851_v28 = vmul.f32 %v3129_v3, %v841_v26  ;;  %v306_v26 = vadd.f32 %v3588_v22, %v3662_v23 }
 0x794   :  { %v852_v29 = vpack.c.bf16 %v851_v28, %v850_v9 }
 0x796   :  { %2378 = vst [vmem:[#allocation2 + $0x20] sm:$0xff] %v852_v29   ;;  %2728 = vmatmul.mubr.bf16.vlgmr.msra.gmra.mxu0 %v852_v29 }
 0x797   :  { %2752 = vmatpush3.bf16.msra.mxu0 %v3306_v30  ;;  %2767 = vmatprep.mubr.msk.bf16.mxu0 %vm3404_vm0, %v3403_v0  ;;  %v309_v30 = vadd.f32 %v3588_v22, %v3666_v25 }
 0x798   :  { %2753 = vmatprep.subr.bf16.mxu0 %v3403_v0 }
 0x79b   :  { %2754 = vmatpush3.bf16.msra.mxu0 %v3307_v31 }
 0x79c   :  { %2755 = vmatprep.subr.bf16.mxu0 %v3403_v0 }
 0x79d   :  { %v3030_v3 = vld [vmem:[#allocation2 + $0x20] sm:$0xff]  }
 0x79f   :  { %2756 = vmatpush3.bf16.msra.mxu0 %v3308_v32 }
 0x7a0   :  { %2757 = vmatprep.subr.bf16.mxu0 %v3403_v0 }
 0x7a3   :  { %2758 = vmatpush3.bf16.msra.mxu0 %v3309_v33 }
 0x7a4   :  { %2759 = vmatprep.subr.bf16.mxu0 %v3403_v0 }
 0x7a7   :  { %2760 = vmatpush3.bf16.msra.mxu0 %v3514_v10 }
 0x7a8   :  { %2761 = vmatprep.subr.bf16.mxu0 %v3403_v0 }
 0x7ab   :  { %2762 = vmatpush3.bf16.msra.mxu0 %v3524_v13 }
 0x7ac   :  { %2763 = vmatprep.subr.bf16.mxu0 %v3403_v0 }
 0x7af   :  { %2764 = vmatpush3.bf16.msra.mxu0 %v3531_v15 }
 0x7b0   :  { %2765 = vmatprep.subr.bf16.mxu0 %v3403_v0 }
 0x7b3   :  { %2766 = vmatpush3.bf16.msra.mxu0 %v3538_v17 }
 0x7b4   :  { %2803 = vmatprep.subr.bf16.mxu0 %v3403_v0 }
 0x856   :  { %v900_v7 = vpop.f32.mrf.mxu0 }
 0x857   :  { %v907_v35 = vadd.f32 %v900_v7, %v298_v34 }
 0x858   :  { %v2729_v10 = vpop.f32.mrf.mxu0 }
 0x859   :  { %v2276_v13 = vmul.f32 -1.442695, %v907_v35 }
 0x85a   :  { %v903_v36 = vpop.f32.mrf.mxu0 }
 0x85b   :  { %3130 = vpow2.f32 %v2276_v13  ;;  %v908_v37 = vadd.f32 %v903_v36, %v301_v11 }
 0x85c   :  { %v2730_v15 = vpop.f32.mrf.mxu0 }
 0x85d   :  { %v2277_v38 = vmul.f32 -1.442695, %v908_v37  ;;  %v3840_v15 = vld [vmem:[#allocation8 + $0x30] sm:$0xff]  }
 0x85f   :  { %3132 = vpow2.f32 %v2277_v38  ;;  %v3844_v38 = vld [vmem:[#allocation8 + $0x28] sm:$0xff]  }
 0x868   :  { %v3131_v39 = vpop.eup %3130 }
 0x869   :  { %v915_v17 = vadd.f32 1.0, %v3131_v39  ;;  %v3848_v39 = vld [vmem:[#allocation8 + $0x20] sm:$0xff]  }
 0x86b   :  { %3134 = vrcp.f32 %v915_v17  ;;  %v3852_v17 = vld [vmem:[#allocation8 + $0x18] sm:$0xff]  }
 0x86c   :  { %v3133_v40 = vpop.eup %3132  ;;  %3136 = vtanh.f32 %v907_v35 }
 0x86d   :  { %v916_v21 = vadd.f32 1.0, %v3133_v40  ;;  %v3856_v40 = vld [vmem:[#allocation8 + $0x10] sm:$0xff]  }
 0x86f   :  { %3138 = vrcp.f32 %v916_v21  ;;  %v3860_v21 = vld [vmem:[#allocation8 + $0x8] sm:$0xff]  }
 0x870   :  { %3140 = vtanh.f32 %v908_v37  ;;  %v3836_v37 = vld [vmem:[#allocation8 + $0x38] sm:$0xff]  }
 0x878   :  { %v3135_v12 = vpop.eup %3134 }
 0x879   :  { %923 = vrot.lane.b32.xlu0 %v3135_v12, %s3406_s16  ;;  %v3137_v27 = vpop.eup %3136 }
 0x87c   :  { %v3139_v16 = vpop.eup %3138 }
 0x87d   :  { %927 = vrot.lane.b32.xlu0 %v3137_v27, %s3399_s14  ;;  %925 = vrot.lane.b32.xlu1 %v3139_v16, %s3406_s16  ;;  %v3141_v41 = vpop.eup %3140 }
 0x881   :  { %931 = vrot.lane.b32.xlu0 %v3135_v12, %s3407_s17  ;;  %929 = vrot.lane.b32.xlu1 %v3141_v41, %s3399_s14 }
 0x885   :  { %933 = vrot.lane.b32.xlu1 %v3139_v16, %s3407_s17 }
 0x8eb   :  { %v924_v4 = vpop.permute.xlu0 %923 }
 0x8ec   :  { %v935_v42 = vmul.f32 %v924_v4, %v3786_v54  ;;  %v3024_v54 = vld [vmem:[#allocation6 + $0x10] sm:$0xff]  }
 0x8ef   :  { %v928_v6 = vpop.permute.xlu0 %927  ;;  %v926_v8 = vpop.permute.xlu1 %925 }
 0x8f0   :  { %v937_v43 = vmul.f32 %v3135_v12, %v928_v6  ;;  %v936_v46 = vmul.f32 %v926_v8, %v3790_v63  ;;  %v3028_v63 = vld [vmem:[#allocation2 + $0x10] sm:$0xff]   ;;  %v3864_v12 = vld [vmem:[#allocation8] sm:$0xff]  }
 0x8f2   :  { %v3818_v44 = vadd.f32 %v937_v43, %v935_v42 }
 0x8f3   :  { %v930_v45 = vpop.permute.xlu1 %929  ;;  %v932_v48 = vpop.permute.xlu0 %931 }
 0x8f4   :  { %v938_v47 = vmul.f32 %v3139_v16, %v930_v45  ;;  %3142 = vtanh.f32 %v3818_v44 }
 0x8f6   :  { %v3822_v49 = vadd.f32 %v938_v47, %v936_v46 }
 0x8f7   :  { %v934_v14 = vpop.permute.xlu1 %933 }
 0x8f8   :  { %3144 = vtanh.f32 %v3822_v49 }
 0x901   :  { %v3143_v50 = vpop.eup %3142 }
 0x902   :  { %v943_v52 = vmul.f32 %v3143_v50, %v932_v48 }
 0x905   :  { %v3145_v51 = vpop.eup %3144 }
 0x906   :  { %v944_v18 = vmul.f32 %v3145_v51, %v934_v14 }
 0x908   :  { %v945_v53 = vpack.c.bf16 %v944_v18, %v943_v52 }
 0x90a   :  { %2383 = vst [vmem:[#allocation2 + $0x28] sm:$0xff] %v945_v53   ;;  %2748 = vmatmul.mubr.bf16.vlgmr.msra.gmra.mxu1 %v945_v53 }
 0x90b   :  { %2772 = vmatpush3.bf16.msra.mxu1 %v3018_v2  ;;  %2787 = vmatprep.mubr.bf16.mxu1 %v3019_v56 }
 0x90c   :  { %2773 = vmatprep.subr.bf16.mxu1 %v3020_v55 }
 0x90f   :  { %2774 = vmatpush3.bf16.msra.mxu1 %v3020_v55 }
 0x910   :  { %2775 = vmatprep.subr.bf16.mxu1 %v3021_v57 }
 0x911   :  { %v3031_v5 = vld [vmem:[#allocation2 + $0x28] sm:$0xff]  }
 0x913   :  { %2776 = vmatpush3.bf16.msra.mxu1 %v3021_v57 }
 0x914   :  { %2777 = vmatprep.subr.bf16.mxu1 %v3022_v59 }
 0x917   :  { %2778 = vmatpush3.bf16.msra.mxu1 %v3022_v59 }
 0x918   :  { %2779 = vmatprep.subr.bf16.mxu1 %v3023_v60 }
 0x91b   :  { %2780 = vmatpush3.bf16.msra.mxu1 %v3023_v60 }
 0x91c   :  { %2781 = vmatprep.subr.bf16.mxu1 %v3024_v54 }
 0x91f   :  { %2782 = vmatpush3.bf16.msra.mxu1 %v3024_v54 }
 0x920   :  { %2783 = vmatprep.subr.bf16.mxu1 %v3025_v58 }
 0x923   :  { %2784 = vmatpush3.bf16.msra.mxu1 %v3025_v58 }
 0x924   :  { %2785 = vmatprep.subr.bf16.mxu1 %v3026_v61 }
 0x927   :  { %2786 = vmatpush3.bf16.msra.mxu1 %v3026_v61 }
 0x928   :  { %2823 = vmatprep.subr.bf16.mxu1 %v3403_v0 }
 0x92a   :  { %2788 = vmatmul.mubr.bf16.vlgmr.msra.gmra.mxu1 %v3027_v62 }
 0x92b   :  { %2791 = vmatprep.mubr.bf16.mxu1 %v3028_v63  ;;  %2824 = vmatpush3.bf16.msra.mxu1 %v3836_v37 }
 0x92c   :  { %2825 = vmatprep.subr.bf16.mxu1 %v3403_v0 }
 0x92f   :  { %2826 = vmatpush3.bf16.msra.mxu1 %v3840_v15 }
 0x930   :  { %2827 = vmatprep.subr.bf16.mxu1 %v3403_v0 }
 0x932   :  { %2792 = vmatmul.mubr.bf16.gmra.mxu1 %v3029_v1 }
 0x933   :  { %2795 = vmatprep.mubr.bf16.mxu1 %v3030_v3  ;;  %2828 = vmatpush3.bf16.msra.mxu1 %v3844_v38 }
 0x934   :  { %2829 = vmatprep.subr.bf16.mxu1 %v3403_v0 }
 0x937   :  { %2830 = vmatpush3.bf16.msra.mxu1 %v3848_v39 }
 0x938   :  { %2831 = vmatprep.subr.bf16.mxu1 %v3403_v0 }
 0x93a   :  { %2796 = vmatmul.mubr.bf16.gmra.mxu1 %v3031_v5 }
 0x93b   :  { %2832 = vmatpush3.bf16.msra.mxu1 %v3852_v17 }
 0x93c   :  { %2833 = vmatprep.subr.bf16.mxu1 %v3403_v0 }
 0x93f   :  { %2834 = vmatpush3.bf16.msra.mxu1 %v3856_v40 }
 0x940   :  { %2835 = vmatprep.subr.bf16.mxu1 %v3403_v0 }
 0x943   :  { %2836 = vmatpush3.bf16.msra.mxu1 %v3860_v21 }
 0x944   :  { %2837 = vmatprep.subr.bf16.mxu1 %v3403_v0 }
 0x947   :  { %2838 = vmatpush3.bf16.msra.mxu1 %v3864_v12 }
 0x948   :  { %2863 = vmatprep.subr.bf16.mxu1 %v3403_v0 }
 0x9ca   :  { %v993_v9 = vpop.f32.mrf.mxu1 }
 0x9cb   :  { %v1000_v28 = vadd.f32 %v993_v9, %v306_v26 }
 0x9cc   :  { %v2749_v29 = vpop.f32.mrf.mxu1 }
 0x9cd   :  { %v2280_v31 = vmul.f32 -1.442695, %v1000_v28 }
 0x9ce   :  { %v996_v32 = vpop.f32.mrf.mxu1 }
 0x9cf   :  { %3146 = vpow2.f32 %v2280_v31  ;;  %v1001_v33 = vadd.f32 %v996_v32, %v309_v30 }
 0x9d0   :  { %v2750_v34 = vpop.f32.mrf.mxu1 }
 0x9d1   :  { %v2281_v7 = vmul.f32 -1.442695, %v1001_v33 }
 0x9d3   :  { %3148 = vpow2.f32 %v2281_v7 }
 0x9dc   :  { %v3147_v35 = vpop.eup %3146 }
 0x9dd   :  { %v1008_v10 = vadd.f32 1.0, %v3147_v35 }
 0x9df   :  { %3150 = vrcp.f32 %v1008_v10 }
 0x9e0   :  { %v3149_v11 = vpop.eup %3148  ;;  %3152 = vtanh.f32 %v1000_v28 }
 0x9e1   :  { %v1009_v13 = vadd.f32 1.0, %v3149_v11 }
 0x9e3   :  { %3154 = vrcp.f32 %v1009_v13 }
 0x9e4   :  { %3156 = vtanh.f32 %v1001_v33 }
 0x9ea   :  { %v3918_v63 = vpop.f32.mrf.mxu1 }
 0x9ec   :  { %v3151_v23 = vpop.eup %3150 }
 0x9ed   :  { %1016 = vrot.lane.b32.xlu0 %v3151_v23, %s3406_s16  ;;  %v3153_v36 = vpop.eup %3152 }
 0x9f0   :  { %v3155_v22 = vpop.eup %3154 }
 0x9f1   :  { %1020 = vrot.lane.b32.xlu0 %v3153_v36, %s3399_s14  ;;  %1018 = vrot.lane.b32.xlu1 %v3155_v22, %s3406_s16  ;;  %v3157_v25 = vpop.eup %3156 }
 0x9f5   :  { %1024 = vrot.lane.b32.xlu0 %v3151_v23, %s3407_s17  ;;  %1022 = vrot.lane.b32.xlu1 %v3157_v25, %s3399_s14 }
 0x9f9   :  { %1026 = vrot.lane.b32.xlu1 %v3155_v22, %s3407_s17 }
 0xa5f   :  { %v1017_v27 = vpop.permute.xlu0 %1016 }
 0xa60   :  { %v1028_v2 = vmul.f32 %v1017_v27, %v3818_v44 }
 0xa63   :  { %v1021_v16 = vpop.permute.xlu0 %1020  ;;  %v1019_v41 = vpop.permute.xlu1 %1018 }
 0xa64   :  { %v1030_v4 = vmul.f32 %v3151_v23, %v1021_v16  ;;  %v1029_v42 = vmul.f32 %v1019_v41, %v3822_v49 }
 0xa66   :  { %v3869_v6 = vadd.f32 %v1030_v4, %v1028_v2 }
 0xa67   :  { %v1023_v8 = vpop.permute.xlu1 %1022  ;;  %v1025_v50 = vpop.permute.xlu0 %1024 }
 0xa68   :  { %v1031_v43 = vmul.f32 %v3155_v22, %v1023_v8  ;;  %3158 = vtanh.f32 %v3869_v6 }
 0xa6a   :  { %v3873_v45 = vadd.f32 %v1031_v43, %v1029_v42 }
 0xa6b   :  { %v1027_v51 = vpop.permute.xlu1 %1026 }
 0xa6c   :  { %3160 = vtanh.f32 %v3873_v45 }
 0xa75   :  { %v3159_v46 = vpop.eup %3158 }
 0xa76   :  { %v1036_v48 = vmul.f32 %v3159_v46, %v1025_v50 }
 0xa79   :  { %v3161_v47 = vpop.eup %3160 }
 0xa7a   :  { %v1037_v14 = vmul.f32 %v3161_v47, %v1027_v51 }
 0xa7c   :  { %v1038_v44 = vpack.c.bf16 %v1037_v14, %v1036_v48 }
 0xa7e   :  { %2388 = vst [vmem:[#allocation2 + $0x30] sm:$0xff] %v1038_v44   ;;  %2768 = vmatmul.mubr.bf16.vlgmr.msra.gmra.mxu0 %v1038_v44 }
 0xa7f   :  { %2804 = vmatpush3.bf16.msra.mxu0 %v3836_v37  ;;  %2819 = vmatprep.mubr.msk.bf16.mxu0 %vm3404_vm0, %v3403_v0 }
 0xa80   :  { %2805 = vmatprep.subr.bf16.mxu0 %v3403_v0 }
 0xa83   :  { %2806 = vmatpush3.bf16.msra.mxu0 %v3840_v15 }
 0xa84   :  { %2807 = vmatprep.subr.bf16.mxu0 %v3403_v0 }
 0xa85   :  { %v3035_v49 = vld [vmem:[#allocation2 + $0x30] sm:$0xff]  }
 0xa86   :  { %2799 = vmatprep.mubr.bf16.mxu1 %v3035_v49 }
 0xa87   :  { %2808 = vmatpush3.bf16.msra.mxu0 %v3844_v38 }
 0xa88   :  { %2809 = vmatprep.subr.bf16.mxu0 %v3403_v0 }
 0xa8b   :  { %2810 = vmatpush3.bf16.msra.mxu0 %v3848_v39 }
 0xa8c   :  { %2811 = vmatprep.subr.bf16.mxu0 %v3403_v0 }
 0xa8f   :  { %2812 = vmatpush3.bf16.msra.mxu0 %v3852_v17 }
 0xa90   :  { %2813 = vmatprep.subr.bf16.mxu0 %v3403_v0 }
 0xa93   :  { %2814 = vmatpush3.bf16.msra.mxu0 %v3856_v40 }
 0xa94   :  { %2815 = vmatprep.subr.bf16.mxu0 %v3403_v0 }
 0xa97   :  { %2816 = vmatpush3.bf16.msra.mxu0 %v3860_v21 }
 0xa98   :  { %2817 = vmatprep.subr.bf16.mxu0 %v3403_v0 }
 0xa9b   :  { %2818 = vmatpush3.bf16.msra.mxu0 %v3864_v12 }
 0xa9c   :  { %2843 = vmatprep.subr.bf16.mxu0 %v3403_v0 }
 0xa9e   :  { %2820 = vmatmul.mubr.bf16.vlgmr.msra.gmra.mxu0 %v3405_v19  ;;  %v3310_v19 = vld [vmem:[%s4197_s3] ss:$0 sm:$0xff] }
 0xa9f   :  { %2844 = vmatpush3.bf16.msra.mxu0 %v3836_v37  ;;  %2859 = vmatprep.mubr.msk.bf16.mxu0 %vm3404_vm0, %v3403_v0  ;;  %v314_v52 = vadd.f32 %v3310_v19, %v3660_v20  ;;  %v317_v56 = vadd.f32 %v3310_v19, %v3664_v24  ;;  %v1311_v20 = vpop.f32.mrf.mxu1  ;;  %v3925_v24 = vld [vmem:[%s4200_s6] ss:$0 sm:$0xff] }
 0xaa0   :  { %2845 = vmatprep.subr.bf16.mxu0 %v3403_v0  ;;  %v1312_v26 = vadd.f32 %v3925_v24, %v1311_v20 }
 0xaa1   :  { %v3920_v5 = vpop.f32.mrf.mxu1 }
 0xaa3   :  { %2846 = vmatpush3.bf16.msra.mxu0 %v3840_v15  ;;  %v1314_v9 = vpop.f32.mrf.mxu1 }
 0xaa4   :  { %2847 = vmatprep.subr.bf16.mxu0 %v3403_v0  ;;  %v1315_v32 = vadd.f32 %v3925_v24, %v1314_v9 }
 0xaa7   :  { %2848 = vmatpush3.bf16.msra.mxu0 %v3844_v38 }
 0xaa8   :  { %2849 = vmatprep.subr.bf16.mxu0 %v3403_v0 }
 0xaab   :  { %2850 = vmatpush3.bf16.msra.mxu0 %v3848_v39 }
 0xaac   :  { %2851 = vmatprep.subr.bf16.mxu0 %v3403_v0 }
 0xaaf   :  { %2852 = vmatpush3.bf16.msra.mxu0 %v3852_v17 }
 0xab0   :  { %2853 = vmatprep.subr.bf16.mxu0 %v3403_v0 }
 0xab3   :  { %2854 = vmatpush3.bf16.msra.mxu0 %v3856_v40 }
 0xab4   :  { %2855 = vmatprep.subr.bf16.mxu0 %v3403_v0 }
 0xab7   :  { %2856 = vmatpush3.bf16.msra.mxu0 %v3860_v21 }
 0xab8   :  { %2857 = vmatprep.subr.bf16.mxu0 %v3403_v0 }
 0xabb   :  { %2858 = vmatpush3.bf16.msra.mxu0 %v3864_v12 }
 0xabc   :  { %2883 = vmatprep.subr.bf16.mxu0 %v3403_v0 }
 0xb3e   :  { %v1086_v18 = vpop.f32.mrf.mxu0 }
 0xb3f   :  { %v1093_v53 = vadd.f32 %v1086_v18, %v314_v52 }
 0xb40   :  { %v2769_v55 = vpop.f32.mrf.mxu0 }
 0xb41   :  { %v2284_v57 = vmul.f32 -1.442695, %v1093_v53 }
 0xb42   :  { %v1089_v59 = vpop.f32.mrf.mxu0 }
 0xb43   :  { %3162 = vpow2.f32 %v2284_v57  ;;  %v1094_v60 = vadd.f32 %v1089_v59, %v317_v56 }
 0xb44   :  { %v2770_v54 = vpop.f32.mrf.mxu0 }
 0xb45   :  { %v2285_v58 = vmul.f32 -1.442695, %v1094_v60 }
 0xb47   :  { %3164 = vpow2.f32 %v2285_v58 }
 0xb50   :  { %v3163_v61 = vpop.eup %3162 }
 0xb51   :  { %v1101_v62 = vadd.f32 1.0, %v3163_v61 }
 0xb53   :  { %3166 = vrcp.f32 %v1101_v62 }
 0xb54   :  { %v3165_v1 = vpop.eup %3164  ;;  %3168 = vtanh.f32 %v1093_v53 }
 0xb55   :  { %v1102_v3 = vadd.f32 1.0, %v3165_v1 }
 0xb57   :  { %3170 = vrcp.f32 %v1102_v3 }
 0xb58   :  { %3172 = vtanh.f32 %v1094_v60 }
 0xb5e   :  { %v1490_v28 = vpop.f32.mrf.mxu0 }
 0xb5f   :  { %v1497_v29 = vadd.f32 %v1490_v28, %v1312_v26 }
 0xb60   :  { %v3167_v30 = vpop.eup %3166  ;;  %v2821_v31 = vpop.f32.mrf.mxu0 }
 0xb61   :  { %v2313_v33 = vmul.f32 -1.442695, %v1497_v29  ;;  %1109 = vrot.lane.b32.xlu0 %v3167_v30, %s3406_s16  ;;  %v3169_v7 = vpop.eup %3168 }
 0xb62   :  { %v1493_v34 = vpop.f32.mrf.mxu0 }
 0xb63   :  { %3174 = vpow2.f32 %v2313_v33  ;;  %v1498_v35 = vadd.f32 %v1493_v34, %v1315_v32  ;;  %v3969_v32 = vpop.f32.mrf.mxu1 }
 0xb64   :  { %v3171_v10 = vpop.eup %3170  ;;  %v2822_v11 = vpop.f32.mrf.mxu0 }
 0xb65   :  { %v2314_v13 = vmul.f32 -1.442695, %v1498_v35  ;;  %1113 = vrot.lane.b32.xlu0 %v3169_v7, %s3399_s14  ;;  %1111 = vrot.lane.b32.xlu1 %v3171_v10, %s3406_s16  ;;  %v3173_v23 = vpop.eup %3172  ;;  %v3971_v33 = vpop.f32.mrf.mxu1 }
 0xb67   :  { %3176 = vpow2.f32 %v2314_v13  ;;  %v3973_v34 = vpop.f32.mrf.mxu1 }
 0xb69   :  { %1117 = vrot.lane.b32.xlu0 %v3167_v30, %s3407_s17  ;;  %1115 = vrot.lane.b32.xlu1 %v3173_v23, %s3399_s14  ;;  %v3975_v7 = vpop.f32.mrf.mxu1 }
 0xb6d   :  { %1119 = vrot.lane.b32.xlu1 %v3171_v10, %s3407_s17 }
 0xb70   :  { %v3175_v36 = vpop.eup %3174 }
 0xb71   :  { %v1505_v22 = vadd.f32 1.0, %v3175_v36 }
 0xb73   :  { %3178 = vrcp.f32 %v1505_v22 }
 0xb74   :  { %v3177_v25 = vpop.eup %3176  ;;  %3180 = vtanh.f32 %v1497_v29 }
 0xb75   :  { %v1506_v27 = vadd.f32 1.0, %v3177_v25 }
 0xb77   :  { %3182 = vrcp.f32 %v1506_v27  ;;  %v1320_v27 = vadd.f32 %v3918_v63, %v3925_v24 }
 0xb78   :  { %3184 = vtanh.f32 %v1498_v35  ;;  %v3977_v35 = vpop.f32.mrf.mxu1 }
 0xb80   :  { %v3179_v16 = vpop.eup %3178 }
 0xb81   :  { %1513 = vrot.lane.b32.xlu0 %v3179_v16, %s3406_s16  ;;  %v3181_v41 = vpop.eup %3180 }
 0xb84   :  { %v3183_v2 = vpop.eup %3182 }
 0xb85   :  { %1515 = vrot.lane.b32.xlu1 %v3183_v2, %s3406_s16  ;;  %1517 = vrot.lane.b32.xlu0 %v3181_v41, %s3399_s14  ;;  %v3185_v4 = vpop.eup %3184 }
 0xb89   :  { %1519 = vrot.lane.b32.xlu1 %v3185_v4, %s3399_s14  ;;  %1521 = vrot.lane.b32.xlu0 %v3179_v16, %s3407_s17  ;;  %v1323_v4 = vadd.f32 %v3920_v5, %v3925_v24 }
 0xb8d   :  { %1523 = vrot.lane.b32.xlu1 %v3183_v2, %s3407_s17 }
 0xbd3   :  { %v1110_v8 = vpop.permute.xlu0 %1109 }
 0xbd4   :  { %v1121_v46 = vmul.f32 %v1110_v8, %v3869_v6 }
 0xbd7   :  { %v1114_v42 = vpop.permute.xlu0 %1113  ;;  %v1112_v43 = vpop.permute.xlu1 %1111 }
 0xbd8   :  { %v1123_v47 = vmul.f32 %v3167_v30, %v1114_v42  ;;  %v1122_v48 = vmul.f32 %v1112_v43, %v3873_v45 }
 0xbda   :  { %v1125_v50 = vadd.f32 %v1123_v47, %v1121_v46 }
 0xbdb   :  { %v1116_v51 = vpop.permute.xlu1 %1115  ;;  %v1118_v52 = vpop.permute.xlu0 %1117 }
 0xbdc   :  { %v1124_v14 = vmul.f32 %v3171_v10, %v1116_v51  ;;  %3186 = vtanh.f32 %v1125_v50  ;;  %v3979_v10 = vpop.f32.mrf.mxu1 }
 0xbde   :  { %v1126_v44 = vadd.f32 %v1124_v14, %v1122_v48  ;;  %v3981_v11 = vpop.f32.mrf.mxu1 }
 0xbdf   :  { %v1120_v18 = vpop.permute.xlu1 %1119 }
 0xbe0   :  { %3188 = vtanh.f32 %v1126_v44  ;;  %v3983_v13 = vpop.f32.mrf.mxu1 }
 0xbe9   :  { %v3187_v49 = vpop.eup %3186 }
 0xbea   :  { %v1129_v53 = vmul.f32 %v3187_v49, %v1118_v52 }
 0xbed   :  { %v3189_v19 = vpop.eup %3188 }
 0xbee   :  { %v1130_v55 = vmul.f32 %v3189_v19, %v1120_v18 }
 0xbf0   :  { %v2392_v56 = vpack.c.bf16 %v1130_v55, %v1129_v53 }
 0xbf2   :  { %2393 = vst [vmem:[#allocation2 + $0x38] sm:$0xff] %v2392_v56  }
 0xbf3   :  { %v1514_v57 = vpop.permute.xlu0 %1513 }
 0xbf4   :  { %v1525_v60 = vmul.f32 0.0, %v1514_v57 }
 0xbf7   :  { %v1516_v59 = vpop.permute.xlu1 %1515  ;;  %v1518_v6 = vpop.permute.xlu0 %1517 }
 0xbf8   :  { %v1527_v54 = vmul.f32 %v3179_v16, %v1518_v6  ;;  %v1526_v62 = vmul.f32 0.0, %v1516_v59 }
 0xbf9   :  { %v3041_v58 = vld [vmem:[#allocation2 + $0x38] sm:$0xff]  }
 0xbfa   :  { %v3943_v61 = vadd.f32 %v1527_v54, %v1525_v60  ;;  %2800 = vmatmul.mubr.bf16.gmra.mxu1 %v3041_v58 }
 0xbfb   :  { %v1520_v45 = vpop.permute.xlu1 %1519  ;;  %2839 = vmatprep.mubr.msk.bf16.mxu1 %vm3404_vm0, %v3403_v0  ;;  %v1522_v9 = vpop.permute.xlu0 %1521 }
 0xbfc   :  { %v1528_v1 = vmul.f32 %v3183_v2, %v1520_v45  ;;  %3190 = vtanh.f32 %v3943_v61 }
 0xbfe   :  { %v3948_v3 = vadd.f32 %v1528_v1, %v1526_v62 }
 0xbff   :  { %v1524_v28 = vpop.permute.xlu1 %1523 }
 0xc00   :  { %3192 = vtanh.f32 %v3948_v3 }
 0xc09   :  { %v3191_v20 = vpop.eup %3190 }
 0xc0a   :  { %v1533_v29 = vmul.f32 %v3191_v20, %v1522_v9 }
 0xc0d   :  { %v3193_v26 = vpop.eup %3192 }
 0xc0e   :  { %v1534_v30 = vmul.f32 %v3193_v26, %v1524_v28 }
 0xc10   :  { %v1537_v31 = vpack.c.bf16 %v1534_v30, %v1533_v29  ;;  %v1331_v29 = vadd.f32 %v3925_v24, %v3975_v7 }
 0xc12   :  { %2840 = vmatmul.mubr.bf16.vlgmr.msra.gmra.mxu1 %v1537_v31 }
 0xc13   :  { %2864 = vmatpush3.bf16.msra.mxu1 %v3836_v37  ;;  %2879 = vmatprep.mubr.msk.bf16.mxu1 %vm3404_vm0, %v3403_v0 }
 0xc14   :  { %2865 = vmatprep.subr.bf16.mxu1 %v3403_v0 }
 0xc17   :  { %2866 = vmatpush3.bf16.msra.mxu1 %v3840_v15 }
 0xc18   :  { %2867 = vmatprep.subr.bf16.mxu1 %v3403_v0 }
 0xc1b   :  { %2868 = vmatpush3.bf16.msra.mxu1 %v3844_v38 }
 0xc1c   :  { %2869 = vmatprep.subr.bf16.mxu1 %v3403_v0 }
 0xc1f   :  { %2870 = vmatpush3.bf16.msra.mxu1 %v3848_v39 }
 0xc20   :  { %2871 = vmatprep.subr.bf16.mxu1 %v3403_v0 }
 0xc23   :  { %2872 = vmatpush3.bf16.msra.mxu1 %v3852_v17 }
 0xc24   :  { %2873 = vmatprep.subr.bf16.mxu1 %v3403_v0 }
 0xc27   :  { %2874 = vmatpush3.bf16.msra.mxu1 %v3856_v40 }
 0xc28   :  { %2875 = vmatprep.subr.bf16.mxu1 %v3403_v0 }
 0xc2b   :  { %2876 = vmatpush3.bf16.msra.mxu1 %v3860_v21 }
 0xc2c   :  { %2877 = vmatprep.subr.bf16.mxu1 %v3403_v0 }
 0xc2f   :  { %2878 = vmatpush3.bf16.msra.mxu1 %v3864_v12 }
 0xc30   :  { %2903 = vmatprep.subr.bf16.mxu1 %v3403_v0 }
 0xcba   :  { %v3985_v23 = vpop.f32.mrf.mxu1 }
 0xcbc   :  { %v3987_v36 = vpop.f32.mrf.mxu1 }
 0xcbe   :  { %v3989_v22 = vpop.f32.mrf.mxu1 }
 0xcc0   :  { %v3991_v25 = vpop.f32.mrf.mxu1 }
 0xcd2   :  { %v1572_v16 = vpop.f32.mrf.mxu1 }
 0xcd3   :  { %v1579_v41 = vadd.f32 %v1572_v16, %v1320_v27 }
 0xcd4   :  { %v2841_v2 = vpop.f32.mrf.mxu1 }
 0xcd5   :  { %v2315_v8 = vmul.f32 -1.442695, %v1579_v41 }
 0xcd6   :  { %v1575_v42 = vpop.f32.mrf.mxu1 }
 0xcd7   :  { %3194 = vpow2.f32 %v2315_v8  ;;  %v1580_v43 = vadd.f32 %v1575_v42, %v1323_v4 }
 0xcd8   :  { %v2842_v46 = vpop.f32.mrf.mxu1 }
 0xcd9   :  { %v2316_v47 = vmul.f32 -1.442695, %v1580_v43 }
 0xcdb   :  { %3196 = vpow2.f32 %v2316_v47 }
 0xce4   :  { %v3195_v50 = vpop.eup %3194 }
 0xce5   :  { %v1587_v51 = vadd.f32 1.0, %v3195_v50 }
 0xce7   :  { %3198 = vrcp.f32 %v1587_v51 }
 0xce8   :  { %v3197_v48 = vpop.eup %3196  ;;  %3200 = vtanh.f32 %v1579_v41 }
 0xce9   :  { %v1588_v14 = vadd.f32 1.0, %v3197_v48 }
 0xceb   :  { %3202 = vrcp.f32 %v1588_v14 }
 0xcec   :  { %3204 = vtanh.f32 %v1580_v43 }
 0xcf4   :  { %v3199_v63 = vpop.eup %3198 }
 0xcf5   :  { %1595 = vrot.lane.b32.xlu0 %v3199_v63, %s3406_s16  ;;  %v3201_v44 = vpop.eup %3200 }
 0xcf8   :  { %v3203_v5 = vpop.eup %3202 }
 0xcf9   :  { %1599 = vrot.lane.b32.xlu0 %v3201_v44, %s3399_s14  ;;  %1597 = vrot.lane.b32.xlu1 %v3203_v5, %s3406_s16  ;;  %v3205_v49 = vpop.eup %3204 }
 0xcfd   :  { %1603 = vrot.lane.b32.xlu0 %v3199_v63, %s3407_s17  ;;  %1601 = vrot.lane.b32.xlu1 %v3205_v49, %s3399_s14 }
 0xd01   :  { %1605 = vrot.lane.b32.xlu1 %v3203_v5, %s3407_s17 }
 0xd67   :  { %v1596_v19 = vpop.permute.xlu0 %1595 }
 0xd68   :  { %v1607_v53 = vmul.f32 %v1596_v19, %v3943_v61 }
 0xd6b   :  { %v1600_v52 = vpop.permute.xlu0 %1599  ;;  %v1598_v18 = vpop.permute.xlu1 %1597 }
 0xd6c   :  { %v1609_v55 = vmul.f32 %v3199_v63, %v1600_v52  ;;  %v1608_v59 = vmul.f32 %v1598_v18, %v3948_v3  ;;  %v1328_v3 = vadd.f32 %v3925_v24, %v3971_v33 }
 0xd6e   :  { %v4004_v56 = vadd.f32 %v1609_v55, %v1607_v53 }
 0xd6f   :  { %v1602_v57 = vpop.permute.xlu1 %1601  ;;  %v1604_v45 = vpop.permute.xlu0 %1603 }
 0xd70   :  { %v1610_v6 = vmul.f32 %v3203_v5, %v1602_v57  ;;  %3206 = vtanh.f32 %v4004_v56 }
 0xd72   :  { %v4008_v60 = vadd.f32 %v1610_v6, %v1608_v59  ;;  %v1336_v6 = vadd.f32 %v3969_v32, %v3925_v24 }
 0xd73   :  { %v1606_v62 = vpop.permute.xlu1 %1605 }
 0xd74   :  { %3208 = vtanh.f32 %v4008_v60 }
 0xd7d   :  { %v3207_v54 = vpop.eup %3206 }
 0xd7e   :  { %v1615_v1 = vmul.f32 %v3207_v54, %v1604_v45  ;;  %v1339_v45 = vadd.f32 %v3973_v34, %v3925_v24 }
 0xd81   :  { %v3209_v58 = vpop.eup %3208 }
 0xd82   :  { %v1616_v20 = vmul.f32 %v3209_v58, %v1606_v62 }
 0xd84   :  { %v1619_v61 = vpack.c.bf16 %v1616_v20, %v1615_v1 }
 0xd86   :  { %2860 = vmatmul.mubr.bf16.vlgmr.msra.gmra.mxu0 %v1619_v61 }
 0xd87   :  { %2884 = vmatpush3.bf16.msra.mxu0 %v3836_v37  ;;  %2899 = vmatprep.mubr.msk.bf16.mxu0 %vm3404_vm0, %v3403_v0 }
 0xd88   :  { %2885 = vmatprep.subr.bf16.mxu0 %v3403_v0 }
 0xd8b   :  { %2886 = vmatpush3.bf16.msra.mxu0 %v3840_v15 }
 0xd8c   :  { %2887 = vmatprep.subr.bf16.mxu0 %v3403_v0 }
 0xd8f   :  { %2888 = vmatpush3.bf16.msra.mxu0 %v3844_v38 }
 0xd90   :  { %2889 = vmatprep.subr.bf16.mxu0 %v3403_v0 }
 0xd93   :  { %2890 = vmatpush3.bf16.msra.mxu0 %v3848_v39 }
 0xd94   :  { %2891 = vmatprep.subr.bf16.mxu0 %v3403_v0 }
 0xd97   :  { %2892 = vmatpush3.bf16.msra.mxu0 %v3852_v17 }
 0xd98   :  { %2893 = vmatprep.subr.bf16.mxu0 %v3403_v0 }
 0xd9b   :  { %2894 = vmatpush3.bf16.msra.mxu0 %v3856_v40 }
 0xd9c   :  { %2895 = vmatprep.subr.bf16.mxu0 %v3403_v0 }
 0xd9f   :  { %2896 = vmatpush3.bf16.msra.mxu0 %v3860_v21 }
 0xda0   :  { %2897 = vmatprep.subr.bf16.mxu0 %v3403_v0 }
 0xda3   :  { %2898 = vmatpush3.bf16.msra.mxu0 %v3864_v12 }
 0xda4   :  { %2923 = vmatprep.subr.bf16.mxu0 %v3403_v0 }
 0xe46   :  { %v1654_v26 = vpop.f32.mrf.mxu0 }
 0xe47   :  { %v1661_v9 = vadd.f32 %v1654_v26, %v1328_v3 }
 0xe48   :  { %v2861_v28 = vpop.f32.mrf.mxu0 }
 0xe49   :  { %v2317_v30 = vmul.f32 -1.442695, %v1661_v9 }
 0xe4a   :  { %v1657_v31 = vpop.f32.mrf.mxu0 }
 0xe4b   :  { %3210 = vpow2.f32 %v2317_v30  ;;  %v1662_v27 = vadd.f32 %v1657_v31, %v1331_v29 }
 0xe4c   :  { %v2862_v16 = vpop.f32.mrf.mxu0 }
 0xe4d   :  { %v2318_v41 = vmul.f32 -1.442695, %v1662_v27 }
 0xe4f   :  { %3212 = vpow2.f32 %v2318_v41 }
 0xe58   :  { %v3211_v2 = vpop.eup %3210 }
 0xe59   :  { %v1669_v4 = vadd.f32 1.0, %v3211_v2 }
 0xe5b   :  { %3214 = vrcp.f32 %v1669_v4 }
 0xe5c   :  { %v3213_v8 = vpop.eup %3212  ;;  %3216 = vtanh.f32 %v1661_v9 }
 0xe5d   :  { %v1670_v42 = vadd.f32 1.0, %v3213_v8 }
 0xe5f   :  { %3218 = vrcp.f32 %v1670_v42 }
 0xe60   :  { %3220 = vtanh.f32 %v1662_v27 }
 0xe68   :  { %v3215_v33 = vpop.eup %3214 }
 0xe69   :  { %1677 = vrot.lane.b32.xlu0 %v3215_v33, %s3406_s16  ;;  %v3217_v43 = vpop.eup %3216 }
 0xe6c   :  { %v3219_v7 = vpop.eup %3218 }
 0xe6d   :  { %1681 = vrot.lane.b32.xlu0 %v3217_v43, %s3399_s14  ;;  %1679 = vrot.lane.b32.xlu1 %v3219_v7, %s3406_s16  ;;  %v3221_v46 = vpop.eup %3220 }
 0xe71   :  { %1685 = vrot.lane.b32.xlu0 %v3215_v33, %s3407_s17  ;;  %1683 = vrot.lane.b32.xlu1 %v3221_v46, %s3399_s14 }
 0xe75   :  { %1687 = vrot.lane.b32.xlu1 %v3219_v7, %s3407_s17 }
 0xedb   :  { %v1678_v47 = vpop.permute.xlu0 %1677 }
 0xedc   :  { %v1689_v48 = vmul.f32 %v1678_v47, %v4004_v56 }
 0xedf   :  { %v1682_v50 = vpop.permute.xlu0 %1681  ;;  %v1680_v51 = vpop.permute.xlu1 %1679 }
 0xee0   :  { %v1691_v14 = vmul.f32 %v3215_v33, %v1682_v50  ;;  %v1690_v5 = vmul.f32 %v1680_v51, %v4008_v60 }
 0xee2   :  { %v4040_v63 = vadd.f32 %v1691_v14, %v1689_v48 }
 0xee3   :  { %v1684_v44 = vpop.permute.xlu1 %1683  ;;  %v1686_v53 = vpop.permute.xlu0 %1685 }
 0xee4   :  { %v1692_v49 = vmul.f32 %v3219_v7, %v1684_v44  ;;  %3222 = vtanh.f32 %v4040_v63  ;;  %v1344_v44 = vadd.f32 %v3925_v24, %v3979_v10 }
 0xee6   :  { %v4044_v19 = vadd.f32 %v1692_v49, %v1690_v5 }
 0xee7   :  { %v1688_v55 = vpop.permute.xlu1 %1687 }
 0xee8   :  { %3224 = vtanh.f32 %v4044_v19 }
 0xef1   :  { %v3223_v52 = vpop.eup %3222 }
 0xef2   :  { %v1697_v57 = vmul.f32 %v3223_v52, %v1686_v53  ;;  %v1347_v52 = vadd.f32 %v3925_v24, %v3983_v13 }
 0xef5   :  { %v3225_v18 = vpop.eup %3224 }
 0xef6   :  { %v1698_v59 = vmul.f32 %v3225_v18, %v1688_v55 }
 0xef8   :  { %v1701_v56 = vpack.c.bf16 %v1698_v59, %v1697_v57 }
 0xefa   :  { %2880 = vmatmul.mubr.bf16.vlgmr.msra.gmra.mxu1 %v1701_v56 }
 0xefb   :  { %2904 = vmatpush3.bf16.msra.mxu1 %v3836_v37  ;;  %2919 = vmatprep.mubr.msk.bf16.mxu1 %vm3404_vm0, %v3403_v0 }
 0xefc   :  { %2905 = vmatprep.subr.bf16.mxu1 %v3403_v0 }
 0xeff   :  { %2906 = vmatpush3.bf16.msra.mxu1 %v3840_v15 }
 0xf00   :  { %2907 = vmatprep.subr.bf16.mxu1 %v3403_v0 }
 0xf03   :  { %2908 = vmatpush3.bf16.msra.mxu1 %v3844_v38 }
 0xf04   :  { %2909 = vmatprep.subr.bf16.mxu1 %v3403_v0 }
 0xf07   :  { %2910 = vmatpush3.bf16.msra.mxu1 %v3848_v39 }
 0xf08   :  { %2911 = vmatprep.subr.bf16.mxu1 %v3403_v0 }
 0xf0b   :  { %2912 = vmatpush3.bf16.msra.mxu1 %v3852_v17 }
 0xf0c   :  { %2913 = vmatprep.subr.bf16.mxu1 %v3403_v0 }
 0xf0f   :  { %2914 = vmatpush3.bf16.msra.mxu1 %v3856_v40 }
 0xf10   :  { %2915 = vmatprep.subr.bf16.mxu1 %v3403_v0 }
 0xf13   :  { %2916 = vmatpush3.bf16.msra.mxu1 %v3860_v21 }
 0xf14   :  { %2917 = vmatprep.subr.bf16.mxu1 %v3403_v0 }
 0xf17   :  { %2918 = vmatpush3.bf16.msra.mxu1 %v3864_v12 }
 0xf18   :  { %2943 = vmatprep.subr.bf16.mxu1 %v3403_v0 }
 0xfba   :  { %v1736_v60 = vpop.f32.mrf.mxu1 }
 0xfbb   :  { %v1743_v54 = vadd.f32 %v1736_v60, %v1336_v6 }
 0xfbc   :  { %v2881_v58 = vpop.f32.mrf.mxu1 }
 0xfbd   :  { %v2319_v62 = vmul.f32 -1.442695, %v1743_v54 }
 0xfbe   :  { %v1739_v1 = vpop.f32.mrf.mxu1 }
 0xfbf   :  { %3226 = vpow2.f32 %v2319_v62  ;;  %v1744_v20 = vadd.f32 %v1739_v1, %v1339_v45 }
 0xfc0   :  { %v2882_v61 = vpop.f32.mrf.mxu1 }
 0xfc1   :  { %v2320_v3 = vmul.f32 -1.442695, %v1744_v20 }
 0xfc3   :  { %3228 = vpow2.f32 %v2320_v3 }
 0xfcc   :  { %v3227_v26 = vpop.eup %3226 }
 0xfcd   :  { %v1751_v9 = vadd.f32 1.0, %v3227_v26 }
 0xfcf   :  { %3230 = vrcp.f32 %v1751_v9 }
 0xfd0   :  { %v3229_v28 = vpop.eup %3228  ;;  %3232 = vtanh.f32 %v1743_v54 }
 0xfd1   :  { %v1752_v29 = vadd.f32 1.0, %v3229_v28 }
 0xfd3   :  { %3234 = vrcp.f32 %v1752_v29 }
 0xfd4   :  { %3236 = vtanh.f32 %v1744_v20 }
 0xfdc   :  { %v3231_v32 = vpop.eup %3230 }
 0xfdd   :  { %1759 = vrot.lane.b32.xlu0 %v3231_v32, %s3406_s16  ;;  %v3233_v30 = vpop.eup %3232 }
 0xfe0   :  { %v3235_v34 = vpop.eup %3234 }
 0xfe1   :  { %1763 = vrot.lane.b32.xlu0 %v3233_v30, %s3399_s14  ;;  %1761 = vrot.lane.b32.xlu1 %v3235_v34, %s3406_s16  ;;  %v3237_v31 = vpop.eup %3236 }
 0xfe5   :  { %1767 = vrot.lane.b32.xlu0 %v3231_v32, %s3407_s17  ;;  %1765 = vrot.lane.b32.xlu1 %v3237_v31, %s3399_s14 }
 0xfe9   :  { %1769 = vrot.lane.b32.xlu1 %v3235_v34, %s3407_s17 }
0x104f   :  { %v1760_v27 = vpop.permute.xlu0 %1759 }
0x1050   :  { %v1771_v2 = vmul.f32 %v1760_v27, %v4040_v63 }
0x1053   :  { %v1764_v16 = vpop.permute.xlu0 %1763  ;;  %v1762_v41 = vpop.permute.xlu1 %1761 }
0x1054   :  { %v1773_v4 = vmul.f32 %v3231_v32, %v1764_v16  ;;  %v1772_v33 = vmul.f32 %v1762_v41, %v4044_v19 }
0x1056   :  { %v4076_v8 = vadd.f32 %v1773_v4, %v1771_v2 }
0x1057   :  { %v1766_v42 = vpop.permute.xlu1 %1765  ;;  %v1768_v50 = vpop.permute.xlu0 %1767 }
0x1058   :  { %v1774_v43 = vmul.f32 %v3235_v34, %v1766_v42  ;;  %3238 = vtanh.f32 %v4076_v8 }
0x105a   :  { %v4080_v7 = vadd.f32 %v1774_v43, %v1772_v33 }
0x105b   :  { %v1770_v51 = vpop.permute.xlu1 %1769 }
0x105c   :  { %3240 = vtanh.f32 %v4080_v7 }
0x1065   :  { %v3239_v46 = vpop.eup %3238 }
0x1066   :  { %v1779_v48 = vmul.f32 %v3239_v46, %v1768_v50 }
0x1069   :  { %v3241_v47 = vpop.eup %3240 }
0x106a   :  { %v1780_v14 = vmul.f32 %v3241_v47, %v1770_v51 }
0x106c   :  { %v1783_v63 = vpack.c.bf16 %v1780_v14, %v1779_v48 }
0x106e   :  { %2900 = vmatmul.mubr.bf16.vlgmr.msra.gmra.mxu0 %v1783_v63 }
0x106f   :  { %2924 = vmatpush3.bf16.msra.mxu0 %v3836_v37  ;;  %2939 = vmatprep.mubr.msk.bf16.mxu0 %vm3404_vm0, %v3403_v0 }
0x1070   :  { %2925 = vmatprep.subr.bf16.mxu0 %v3403_v0 }
0x1073   :  { %2926 = vmatpush3.bf16.msra.mxu0 %v3840_v15 }
0x1074   :  { %2927 = vmatprep.subr.bf16.mxu0 %v3403_v0 }
0x1077   :  { %2928 = vmatpush3.bf16.msra.mxu0 %v3844_v38 }
0x1078   :  { %2929 = vmatprep.subr.bf16.mxu0 %v3403_v0 }
0x107b   :  { %2930 = vmatpush3.bf16.msra.mxu0 %v3848_v39 }
0x107c   :  { %2931 = vmatprep.subr.bf16.mxu0 %v3403_v0 }
0x107f   :  { %2932 = vmatpush3.bf16.msra.mxu0 %v3852_v17 }
0x1080   :  { %2933 = vmatprep.subr.bf16.mxu0 %v3403_v0 }
0x1083   :  { %2934 = vmatpush3.bf16.msra.mxu0 %v3856_v40 }
0x1084   :  { %2935 = vmatprep.subr.bf16.mxu0 %v3403_v0 }
0x1087   :  { %2936 = vmatpush3.bf16.msra.mxu0 %v3860_v21 }
0x1088   :  { %2937 = vmatprep.subr.bf16.mxu0 %v3403_v0 }
0x108b   :  { %2938 = vmatpush3.bf16.msra.mxu0 %v3864_v12 }
0x108c   :  { %2963 = vmatprep.subr.bf16.mxu0 %v3403_v0 }
0x112e   :  { %v1818_v5 = vpop.f32.mrf.mxu0 }
0x112f   :  { %v1825_v49 = vadd.f32 %v1818_v5, %v1344_v44 }
0x1130   :  { %v2901_v19 = vpop.f32.mrf.mxu0 }
0x1131   :  { %v2321_v18 = vmul.f32 -1.442695, %v1825_v49 }
0x1132   :  { %v1821_v53 = vpop.f32.mrf.mxu0 }
0x1133   :  { %3242 = vpow2.f32 %v2321_v18  ;;  %v1826_v55 = vadd.f32 %v1821_v53, %v1347_v52 }
0x1134   :  { %v2902_v57 = vpop.f32.mrf.mxu0 }
0x1135   :  { %v2322_v59 = vmul.f32 -1.442695, %v1826_v55 }
0x1137   :  { %3244 = vpow2.f32 %v2322_v59 }
0x1140   :  { %v3243_v56 = vpop.eup %3242 }
0x1141   :  { %v1833_v6 = vadd.f32 1.0, %v3243_v56 }
0x1143   :  { %3246 = vrcp.f32 %v1833_v6 }
0x1144   :  { %v3245_v60 = vpop.eup %3244  ;;  %3248 = vtanh.f32 %v1825_v49 }
0x1145   :  { %v1834_v54 = vadd.f32 1.0, %v3245_v60  ;;  %v1360_v60 = vadd.f32 %v3925_v24, %v3987_v36 }
0x1147   :  { %3250 = vrcp.f32 %v1834_v54 }
0x1148   :  { %3252 = vtanh.f32 %v1826_v55 }
0x1150   :  { %v3247_v10 = vpop.eup %3246 }
0x1151   :  { %1841 = vrot.lane.b32.xlu0 %v3247_v10, %s3406_s16  ;;  %v3249_v58 = vpop.eup %3248 }
0x1154   :  { %v3251_v13 = vpop.eup %3250 }
0x1155   :  { %1845 = vrot.lane.b32.xlu0 %v3249_v58, %s3399_s14  ;;  %1843 = vrot.lane.b32.xlu1 %v3251_v13, %s3406_s16  ;;  %v3253_v45 = vpop.eup %3252 }
0x1159   :  { %1849 = vrot.lane.b32.xlu0 %v3247_v10, %s3407_s17  ;;  %1847 = vrot.lane.b32.xlu1 %v3253_v45, %s3399_s14 }
0x115d   :  { %1851 = vrot.lane.b32.xlu1 %v3251_v13, %s3407_s17 }
0x11c3   :  { %v1842_v62 = vpop.permute.xlu0 %1841 }
0x11c4   :  { %v1853_v61 = vmul.f32 %v1842_v62, %v4076_v8 }
0x11c7   :  { %v1846_v1 = vpop.permute.xlu0 %1845  ;;  %v1844_v20 = vpop.permute.xlu1 %1843 }
0x11c8   :  { %v1855_v3 = vmul.f32 %v3247_v10, %v1846_v1  ;;  %v1854_v28 = vmul.f32 %v1844_v20, %v4080_v7 }
0x11ca   :  { %v4112_v26 = vadd.f32 %v1855_v3, %v1853_v61 }
0x11cb   :  { %v1848_v9 = vpop.permute.xlu1 %1847  ;;  %v1850_v31 = vpop.permute.xlu0 %1849 }
0x11cc   :  { %v1856_v29 = vmul.f32 %v3251_v13, %v1848_v9  ;;  %3254 = vtanh.f32 %v4112_v26  ;;  %v1363_v13 = vadd.f32 %v3925_v24, %v3991_v25 }
0x11ce   :  { %v4116_v32 = vadd.f32 %v1856_v29, %v1854_v28 }
0x11cf   :  { %v1852_v27 = vpop.permute.xlu1 %1851 }
0x11d0   :  { %3256 = vtanh.f32 %v4116_v32 }
0x11d9   :  { %v3255_v30 = vpop.eup %3254 }
0x11da   :  { %v1861_v16 = vmul.f32 %v3255_v30, %v1850_v31 }
0x11dd   :  { %v3257_v34 = vpop.eup %3256 }
0x11de   :  { %v1862_v41 = vmul.f32 %v3257_v34, %v1852_v27 }
0x11e0   :  { %v1865_v2 = vpack.c.bf16 %v1862_v41, %v1861_v16 }
0x11e2   :  { %2920 = vmatmul.mubr.bf16.vlgmr.msra.gmra.mxu1 %v1865_v2 }
0x11e3   :  { %2944 = vmatpush3.bf16.msra.mxu1 %v3836_v37  ;;  %2959 = vmatprep.mubr.msk.bf16.mxu1 %vm3404_vm0, %v3403_v0  ;;  %v1352_v37 = vadd.f32 %v3977_v35, %v3925_v24 }
0x11e4   :  { %2945 = vmatprep.subr.bf16.mxu1 %v3403_v0 }
0x11e7   :  { %2946 = vmatpush3.bf16.msra.mxu1 %v3840_v15 }
0x11e8   :  { %2947 = vmatprep.subr.bf16.mxu1 %v3403_v0 }
0x11eb   :  { %2948 = vmatpush3.bf16.msra.mxu1 %v3844_v38 }
0x11ec   :  { %2949 = vmatprep.subr.bf16.mxu1 %v3403_v0 }
0x11ef   :  { %2950 = vmatpush3.bf16.msra.mxu1 %v3848_v39 }
0x11f0   :  { %2951 = vmatprep.subr.bf16.mxu1 %v3403_v0 }
0x11f3   :  { %2952 = vmatpush3.bf16.msra.mxu1 %v3852_v17  ;;  %v1355_v17 = vadd.f32 %v3981_v11, %v3925_v24 }
0x11f4   :  { %2953 = vmatprep.subr.bf16.mxu1 %v3403_v0 }
0x11f7   :  { %2954 = vmatpush3.bf16.msra.mxu1 %v3856_v40 }
0x11f8   :  { %2955 = vmatprep.subr.bf16.mxu1 %v3403_v0 }
0x11fb   :  { %2956 = vmatpush3.bf16.msra.mxu1 %v3860_v21 }
0x11fc   :  { %2957 = vmatprep.subr.bf16.mxu1 %v3403_v0 }
0x11ff   :  { %2958 = vmatpush3.bf16.msra.mxu1 %v3864_v12 }
0x12a2   :  { %v1900_v15 = vpop.f32.mrf.mxu1 }
0x12a3   :  { %v1907_v38 = vadd.f32 %v1900_v15, %v1352_v37 }
0x12a4   :  { %v2921_v39 = vpop.f32.mrf.mxu1 }
0x12a5   :  { %v2323_v4 = vmul.f32 -1.442695, %v1907_v38 }
0x12a6   :  { %v1903_v8 = vpop.f32.mrf.mxu1 }
0x12a7   :  { %3258 = vpow2.f32 %v2323_v4  ;;  %v1908_v40 = vadd.f32 %v1903_v8, %v1355_v17 }
0x12a8   :  { %v2922_v42 = vpop.f32.mrf.mxu1 }
0x12a9   :  { %v2324_v33 = vmul.f32 -1.442695, %v1908_v40 }
0x12ab   :  { %3260 = vpow2.f32 %v2324_v33 }
0x12b4   :  { %v3259_v21 = vpop.eup %3258 }
0x12b5   :  { %v1915_v43 = vadd.f32 1.0, %v3259_v21  ;;  %v3042_v21 = vld [vmem:[#allocation9 + $0x38] sm:$0xff]  }
0x12b7   :  { %3262 = vrcp.f32 %v1915_v43  ;;  %v1368_v43 = vadd.f32 %v3985_v23, %v3925_v24  ;;  %v3044_v23 = vld [vmem:[#allocation9 + $0x28] sm:$0xff]  }
0x12b8   :  { %v3261_v12 = vpop.eup %3260  ;;  %3264 = vtanh.f32 %v1907_v38 }
0x12b9   :  { %v1916_v7 = vadd.f32 1.0, %v3261_v12 }
0x12bb   :  { %3266 = vrcp.f32 %v1916_v7 }
0x12bc   :  { %3268 = vtanh.f32 %v1908_v40 }
0x12c4   :  { %v3263_v35 = vpop.eup %3262 }
0x12c5   :  { %1923 = vrot.lane.b32.xlu0 %v3263_v35, %s3406_s16  ;;  %v3265_v46 = vpop.eup %3264 }
0x12c8   :  { %v3267_v11 = vpop.eup %3266 }
0x12c9   :  { %1927 = vrot.lane.b32.xlu0 %v3265_v46, %s3399_s14  ;;  %1925 = vrot.lane.b32.xlu1 %v3267_v11, %s3406_s16  ;;  %v3269_v47 = vpop.eup %3268  ;;  %v1371_v46 = vadd.f32 %v3989_v22, %v3925_v24  ;;  %v3045_v24 = vld [vmem:[#allocation9 + $0x20] sm:$0xff]  }
0x12cd   :  { %1931 = vrot.lane.b32.xlu0 %v3263_v35, %s3407_s17  ;;  %1929 = vrot.lane.b32.xlu1 %v3269_v47, %s3399_s14 }
0x12d1   :  { %1933 = vrot.lane.b32.xlu1 %v3267_v11, %s3407_s17 }
0x1337   :  { %v1924_v50 = vpop.permute.xlu0 %1923 }
0x1338   :  { %v1935_v14 = vmul.f32 %v1924_v50, %v4112_v26 }
0x133b   :  { %v1928_v51 = vpop.permute.xlu0 %1927  ;;  %v1926_v48 = vpop.permute.xlu1 %1925 }
0x133c   :  { %v1937_v63 = vmul.f32 %v3263_v35, %v1928_v51  ;;  %v1936_v49 = vmul.f32 %v1926_v48, %v4116_v32 }
0x133e   :  { %v1939_v44 = vadd.f32 %v1937_v63, %v1935_v14 }
0x133f   :  { %v1930_v5 = vpop.permute.xlu1 %1929  ;;  %v1932_v55 = vpop.permute.xlu0 %1931 }
0x1340   :  { %v1938_v19 = vmul.f32 %v3267_v11, %v1930_v5  ;;  %3270 = vtanh.f32 %v1939_v44  ;;  %v3043_v5 = vld [vmem:[#allocation9 + $0x30] sm:$0xff]  }
0x1342   :  { %v1940_v52 = vadd.f32 %v1938_v19, %v1936_v49  ;;  %v3046_v19 = vld [vmem:[#allocation9 + $0x18] sm:$0xff]  }
0x1343   :  { %v1934_v57 = vpop.permute.xlu1 %1933 }
0x1344   :  { %3272 = vtanh.f32 %v1940_v52 }
0x134d   :  { %v3271_v18 = vpop.eup %3270 }
0x134e   :  { %v1943_v59 = vmul.f32 %v3271_v18, %v1932_v55 }
0x1351   :  { %v3273_v53 = vpop.eup %3272 }
0x1352   :  { %v1944_v56 = vmul.f32 %v3273_v53, %v1934_v57  ;;  %v3047_v53 = vld [vmem:[#allocation9 + $0x10] sm:$0xff]   ;;  %v3048_v57 = vld [vmem:[#allocation9 + $0x8] sm:$0xff]  }
0x1354   :  { %v1947_v6 = vpack.c.bf16 %v1944_v56, %v1943_v59  ;;  %v3049_v59 = vld [vmem:[#allocation9] sm:$0xff]  }
0x1356   :  { %2940 = vmatmul.mubr.bf16.vlgmr.msra.gmra.mxu0 %v1947_v6 }
0x1357   :  { %2979 = vmatprep.mubr.msk.bf16.mxu0 %vm3404_vm0, %v3403_v0  ;;  %2964 = vmatpush3.bf16.msra.mxu0 %v3042_v21 }
0x1358   :  { %2965 = vmatprep.subr.bf16.mxu0 %v3403_v0 }
0x135b   :  { %2966 = vmatpush3.bf16.msra.mxu0 %v3043_v5 }
0x135c   :  { %2967 = vmatprep.subr.bf16.mxu0 %v3403_v0 }
0x135f   :  { %2968 = vmatpush3.bf16.msra.mxu0 %v3044_v23 }
0x1360   :  { %2969 = vmatprep.subr.bf16.mxu0 %v3403_v0 }
0x1363   :  { %2970 = vmatpush3.bf16.msra.mxu0 %v3045_v24 }
0x1364   :  { %2971 = vmatprep.subr.bf16.mxu0 %v3403_v0 }
0x1367   :  { %2972 = vmatpush3.bf16.msra.mxu0 %v3046_v19 }
0x1368   :  { %2973 = vmatprep.subr.bf16.mxu0 %v3403_v0 }
0x136b   :  { %2974 = vmatpush3.bf16.msra.mxu0 %v3047_v53 }
0x136c   :  { %2975 = vmatprep.subr.bf16.mxu0 %v3403_v0 }
0x136f   :  { %2976 = vmatpush3.bf16.msra.mxu0 %v3048_v57 }
0x1370   :  { %2977 = vmatprep.subr.bf16.mxu0 %v3403_v0 }
0x1373   :  { %2978 = vmatpush3.bf16.msra.mxu0 %v3049_v59 }
0x1416   :  { %v1982_v54 = vpop.f32.mrf.mxu0 }
0x1417   :  { %v1989_v10 = vadd.f32 %v1982_v54, %v1360_v60 }
0x1418   :  { %v2941_v58 = vpop.f32.mrf.mxu0 }
0x1419   :  { %v2325_v45 = vmul.f32 -1.442695, %v1989_v10 }
0x141a   :  { %v1985_v62 = vpop.f32.mrf.mxu0 }
0x141b   :  { %3274 = vpow2.f32 %v2325_v45  ;;  %v1990_v1 = vadd.f32 %v1985_v62, %v1363_v13 }
0x141c   :  { %v2942_v20 = vpop.f32.mrf.mxu0 }
0x141d   :  { %v2326_v61 = vmul.f32 -1.442695, %v1990_v1 }
0x141f   :  { %3276 = vpow2.f32 %v2326_v61 }
0x1428   :  { %v3275_v3 = vpop.eup %3274 }
0x1429   :  { %v1997_v26 = vadd.f32 1.0, %v3275_v3 }
0x142b   :  { %3278 = vrcp.f32 %v1997_v26 }
0x142c   :  { %v3277_v9 = vpop.eup %3276  ;;  %3280 = vtanh.f32 %v1989_v10 }
0x142d   :  { %v1998_v28 = vadd.f32 1.0, %v3277_v9 }
0x142f   :  { %3282 = vrcp.f32 %v1998_v28 }
0x1430   :  { %3284 = vtanh.f32 %v1990_v1 }
0x1438   :  { %v3279_v36 = vpop.eup %3278 }
0x1439   :  { %2005 = vrot.lane.b32.xlu0 %v3279_v36, %s3406_s16  ;;  %v3281_v29 = vpop.eup %3280 }
0x143c   :  { %v3283_v25 = vpop.eup %3282 }
0x143d   :  { %2009 = vrot.lane.b32.xlu0 %v3281_v29, %s3399_s14  ;;  %2007 = vrot.lane.b32.xlu1 %v3283_v25, %s3406_s16  ;;  %v3285_v32 = vpop.eup %3284 }
0x1441   :  { %2013 = vrot.lane.b32.xlu0 %v3279_v36, %s3407_s17  ;;  %2011 = vrot.lane.b32.xlu1 %v3285_v32, %s3399_s14 }
0x1445   :  { %2015 = vrot.lane.b32.xlu1 %v3283_v25, %s3407_s17 }
0x14ab   :  { %v2006_v30 = vpop.permute.xlu0 %2005 }
0x14ac   :  { %v2017_v27 = vmul.f32 %v2006_v30, %v1939_v44 }
0x14af   :  { %v2010_v34 = vpop.permute.xlu0 %2009  ;;  %v2008_v31 = vpop.permute.xlu1 %2007 }
0x14b0   :  { %v2019_v16 = vmul.f32 %v3279_v36, %v2010_v34  ;;  %v2018_v37 = vmul.f32 %v2008_v31, %v1940_v52  ;;  %v2329_v36 = vld [vmem:[%s4202_s8] ss:$0 sm:$0xff] }
0x14b2   :  { %v4160_v41 = vadd.f32 %v2019_v16, %v2017_v27 }
0x14b3   :  { %v2012_v2 = vpop.permute.xlu1 %2011  ;;  %v2014_v4 = vpop.permute.xlu0 %2013 }
0x14b4   :  { %v2020_v15 = vmul.f32 %v3283_v25, %v2012_v2  ;;  %3286 = vtanh.f32 %v4160_v41 }
0x14b6   :  { %v4163_v38 = vadd.f32 %v2020_v15, %v2018_v37 }
0x14b7   :  { %v2016_v8 = vpop.permute.xlu1 %2015 }
0x14b8   :  { %3288 = vtanh.f32 %v4163_v38 }
0x14c1   :  { %v3287_v39 = vpop.eup %3286 }
0x14c2   :  { %v2025_v40 = vmul.f32 %v3287_v39, %v2014_v4 }
0x14c5   :  { %v3289_v17 = vpop.eup %3288 }
0x14c6   :  { %v2026_v42 = vmul.f32 %v3289_v17, %v2016_v8 }
0x14c8   :  { %v2029_v33 = vpack.c.bf16 %v2026_v42, %v2025_v40 }
0x14ca   :  { %2960 = vmatmul.mubr.bf16.vlgmr.msra.gmra.mxu1 %v2029_v33 }
0x158a   :  { %v2064_v12 = vpop.f32.mrf.mxu1 }
0x158b   :  { %v2071_v7 = vadd.f32 %v2064_v12, %v1368_v43 }
0x158c   :  { %v2961_v35 = vpop.f32.mrf.mxu1 }
0x158d   :  { %v2327_v11 = vmul.f32 -1.442695, %v2071_v7 }
0x158e   :  { %v2067_v47 = vpop.f32.mrf.mxu1 }
0x158f   :  { %3290 = vpow2.f32 %v2327_v11  ;;  %v2072_v50 = vadd.f32 %v2067_v47, %v1371_v46 }
0x1590   :  { %v2962_v51 = vpop.f32.mrf.mxu1 }
0x1591   :  { %v2328_v48 = vmul.f32 -1.442695, %v2072_v50 }
0x1593   :  { %3292 = vpow2.f32 %v2328_v48 }
0x159c   :  { %v3291_v14 = vpop.eup %3290 }
0x159d   :  { %v2079_v63 = vadd.f32 1.0, %v3291_v14 }
0x159f   :  { %3294 = vrcp.f32 %v2079_v63 }
0x15a0   :  { %v3293_v44 = vpop.eup %3292  ;;  %3296 = vtanh.f32 %v2071_v7 }
0x15a1   :  { %v2080_v49 = vadd.f32 1.0, %v3293_v44 }
0x15a3   :  { %3298 = vrcp.f32 %v2080_v49 }
0x15a4   :  { %3300 = vtanh.f32 %v2072_v50 }
0x15ac   :  { %v3295_v22 = vpop.eup %3294 }
0x15ad   :  { %2087 = vrot.lane.b32.xlu0 %v3295_v22, %s3406_s16  ;;  %v3297_v52 = vpop.eup %3296 }
0x15b0   :  { %v3299_v18 = vpop.eup %3298 }
0x15b1   :  { %2091 = vrot.lane.b32.xlu0 %v3297_v52, %s3399_s14  ;;  %2089 = vrot.lane.b32.xlu1 %v3299_v18, %s3406_s16  ;;  %v3301_v55 = vpop.eup %3300 }
0x15b5   :  { %2095 = vrot.lane.b32.xlu0 %v3295_v22, %s3407_s17  ;;  %2093 = vrot.lane.b32.xlu1 %v3301_v55, %s3399_s14 }
0x15b9   :  { %2097 = vrot.lane.b32.xlu1 %v3299_v18, %s3407_s17 }
0x161f   :  { %v2088_v56 = vpop.permute.xlu0 %2087 }
0x1620   :  { %v2099_v54 = vmul.f32 %v2088_v56, %v4160_v41 }
0x1623   :  { %v2092_v6 = vpop.permute.xlu0 %2091  ;;  %v2090_v60 = vpop.permute.xlu1 %2089 }
0x1624   :  { %v2101_v10 = vmul.f32 %v3295_v22, %v2092_v6  ;;  %v2100_v45 = vmul.f32 %v2090_v60, %v4163_v38 }
0x1626   :  { %v2103_v58 = vadd.f32 %v2101_v10, %v2099_v54 }
0x1627   :  { %v2094_v13 = vpop.permute.xlu1 %2093  ;;  %v2096_v61 = vpop.permute.xlu0 %2095 }
0x1628   :  { %v2102_v62 = vmul.f32 %v3299_v18, %v2094_v13  ;;  %3302 = vtanh.f32 %v2103_v58 }
0x162a   :  { %v2104_v1 = vadd.f32 %v2102_v62, %v2100_v45 }
0x162b   :  { %v2098_v3 = vpop.permute.xlu1 %2097 }
0x162c   :  { %3304 = vtanh.f32 %v2104_v1 }
0x1635   :  { %v3303_v20 = vpop.eup %3302 }
0x1636   :  { %v2107_v26 = vmul.f32 %v3303_v20, %v2096_v61 }
0x1639   :  { %v3305_v0 = vpop.eup %3304 }
0x163a   :  { %v2108_v9 = vmul.f32 %v3305_v0, %v2098_v3 }
0x163c   :  { %v2109_v28 = vpack.c.bf16 %v2108_v9, %v2107_v26 }
0x163e   :  { %2980 = vmatmul.mubr.bf16.vlgmr.msra.gmra.mxu0 %v2109_v28 }
0x16fe   :  { %v2215_v29 = vpop.f32.mrf.mxu0 }
0x16ff   :  { %v2216_v25 = vadd.f32 %v2329_v36, %v2215_v29 }
0x1700   :  { %v2981_v32 = vpop.f32.mrf.mxu0 }
0x1701   :  { %2222 = vst [vmem:[%s4203_s9] sm:$0xff] %v2216_v25 }
0x1702   :  { %v2218_v30 = vpop.f32.mrf.mxu0 }
0x1703   :  { %v2219_v34 = vadd.f32 %v2329_v36, %v2218_v30 }
0x1704   :  { %v2982_v31 = vpop.f32.mrf.mxu0 }
0x1705   :  { %2223 = vst [vmem:[%s4203_s9 + $0x8] sm:$0xff] %v2219_v34 }
0x1706   :  { %2228 = vsyncpa [#allocation5], 1 }
0x1707   :  { %2229 = vsyncpa [#allocation7], 1 }
0x1708   :  { %2230 = vsyncpa [#allocation10], 1 }

</bundles_post_ra>
